<compile_context>
chip_gen: v7x
topology: tpu7x:2x2x1
jax: 0.10.0
libtpu: 0.0.40
codegen_flags: <defaults>
</compile_context>

<pallas_src>
import functools

import jax
import jax.numpy as jnp
import numpy as np
from jax.experimental import pallas as pl
from jax.experimental.pallas import tpu as pltpu


def _pixel_shuffle_kernel(x_ref, o_ref, *, scale, td):
    """x_ref: (1, r^3, TD, H, W)        all input channels of one output channel,
                                        TD depth slices; channel order = (s1, s2, s3).
       o_ref: (1, 1, TD, r, H, r*W*r)   contiguous view of the output block
                                        (depth d*r+s1, rows h*r+s2 folded into layout;
                                         lane dim q = s2*W*r + w*r + s3).
    """
    r = scale
    H = x_ref.shape[3]
    W = x_ref.shape[4]
    Wr = W * r

    # Exact one-hot lane-interleave matrices, built in-kernel (iota + compare only,
    # no integer div/mod):  bmats[s3][w, j] = 1  iff  j == w*r + s3.
    w_i = jax.lax.broadcasted_iota(jnp.int32, (W, Wr), 0)
    j_i = jax.lax.broadcasted_iota(jnp.int32, (W, Wr), 1)
    bmats = [(j_i == w_i * r + s3).astype(jnp.float32) for s3 in range(r)]

    for t in range(td):              # depth slices inside this block
        for s1 in range(r):          # output depth sub-offset
            for s2 in range(r):      # output row sub-offset
                base = s1 * r * r + s2 * r
                # inner[h, w*r + s3] = x[base + s3, t, h, w]
                # Exact: one-hot matrix, f32 accumulate, HIGHEST precision.
                inner = jnp.dot(
                    x_ref[0, base, t, :, :].astype(jnp.float32), bmats[0],
                    preferred_element_type=jnp.float32,
                    precision=jax.lax.Precision.HIGHEST)
                for s3 in range(1, r):
                    inner = inner + jnp.dot(
                        x_ref[0, base + s3, t, :, :].astype(jnp.float32), bmats[s3],
                        preferred_element_type=jnp.float32,
                        precision=jax.lax.Precision.HIGHEST)
                # Rows (h*r + s2) of output depth-slice (d*r + s1): in the 6-D view
                # this is the static lane range [s2*Wr, (s2+1)*Wr) of (t, s1).
                o_ref[0, 0, t, s1, :, s2 * Wr:(s2 + 1) * Wr] = inner.astype(o_ref.dtype)


def pixel_shuffle_3d(x, scale):
    """Pallas TPU implementation of PixelShuffle3d.forward (NCDHW layout)."""
    B, C, D, H, W = x.shape
    r = int(scale)
    assert C % (r ** 3) == 0, "channels must be divisible by scale**3"
    n_out = C // (r ** 3)
    Wr = W * r

    # Depth tile: largest divisor of D (capped at 8 to bound unrolling) such that the
    # per-step input+output payload stays <= ~2 MiB (so double-buffered blocks are only
    # a few MiB — safe even on v7x's 64 MiB VMEM).
    bytes_per_slice = 2 * (r ** 3) * H * W * x.dtype.itemsize  # in + out per depth slice
    td = 1
    for cand in range(1, min(D, 8) + 1):
        if D % cand == 0 and cand * bytes_per_slice <= (2 << 20):
            td = cand

    kernel = functools.partial(_pixel_shuffle_kernel, scale=r, td=td)

    # The kernel writes a contiguous *view* of the final output:
    #   (B, n_out, D*r, H*r, W*r)  ==  (B, n_out, D, r, H, r*W*r)   (row-major)
    # so the final reshape below is free metadata plumbing.
    out_view = pl.pallas_call(
        kernel,
        out_shape=jax.ShapeDtypeStruct((B, n_out, D, r, H, r * Wr), x.dtype),
        grid_spec=pltpu.PrefetchScalarGridSpec(
            num_scalar_prefetch=0,
            grid=(B, n_out, D // td),
            in_specs=[
                pl.BlockSpec((1, r ** 3, td, H, W),
                             lambda b, c, dt: (b, c, dt, 0, 0)),
            ],
            out_specs=pl.BlockSpec((1, 1, td, r, H, r * Wr),
                                   lambda b, c, dt: (b, c, dt, 0, 0, 0)),
        ),
        compiler_params=pltpu.CompilerParams(
            dimension_semantics=("parallel", "parallel", "parallel"),
            vmem_limit_bytes=32 * 1024 * 1024),
    )(x)

    return out_view.reshape(B, n_out, D * r, H * r, Wr)


def pixel_shuffle_3d_ref(x, scale):
    """Pure-JAX reference matching the PyTorch module exactly."""
    B, C, D, H, W = x.shape
    r = scale
    n_out = C // (r ** 3)
    xv = x.reshape(B, n_out, r, r, r, D, H, W)
    out = jnp.transpose(xv, (0, 1, 5, 2, 6, 3, 7, 4))
    return out.reshape(B, n_out, D * r, H * r, W * r)


if __name__ == "__main__":
    k1, k2 = jax.random.split(jax.random.PRNGKey(0))

    # Scale-2 path of RCAN's Upsampler (conv -> 8*n_feat channels -> shuffle).
    B, n_out, D, H, W, r = 2, 2, 4, 8, 8, 2
    x = jax.random.normal(k1, (B, n_out * r ** 3, D, H, W), dtype=jnp.float32)
    out = jax.block_until_ready(pixel_shuffle_3d(x, r))
    ref = pixel_shuffle_3d_ref(x, r)
    assert out.shape == (B, n_out, D * r, H * r, W * r)
    np.testing.assert_allclose(np.asarray(out), np.asarray(ref), rtol=1e-6, atol=1e-6)

    # Scale-3 path (27*n_feat channels), to cover the non-power-of-two case.
    B3, n3, D3, H3, W3, r3 = 1, 1, 2, 8, 8, 3
    x3 = jax.random.normal(k2, (B3, n3 * r3 ** 3, D3, H3, W3), dtype=jnp.float32)
    out3 = jax.block_until_ready(pixel_shuffle_3d(x3, r3))
    ref3 = pixel_shuffle_3d_ref(x3, r3)
    assert out3.shape == (B3, n3, D3 * r3, H3 * r3, W3 * r3)
    np.testing.assert_allclose(np.asarray(out3), np.asarray(ref3), rtol=1e-6, atol=1e-6)

    print("KERNEL_OK")
</pallas_src>

<mosaic_0001>
module attributes {stable_mosaic.version = 11 : i64} {
  func.func @_pixel_shuffle_kernel(%arg0: i32, %arg1: i32, %arg2: i32, %arg3: memref<1x8x4x8x8xf32, #tpu.memory_space<vmem>>, %arg4: memref<1x1x4x2x8x32xf32, #tpu.memory_space<vmem>>) attributes {dimension_semantics = [#tpu.dimension_semantics<parallel>, #tpu.dimension_semantics<parallel>, #tpu.dimension_semantics<parallel>], iteration_bounds = array<i64: 2, 2, 1>, scalar_prefetch = 0 : i64, scratch_operands = 0 : i64, tpu.core_type = #tpu.core_type<tc>, window_params = [{transform_indices = @transform_0, window_bounds = array<i64: 1, 8, 4, 8, 8>}, {transform_indices = @transform_1, window_bounds = array<i64: 1, 1, 4, 2, 8, 32>}]} {
    %0 = tpu.iota {dimensions = array<i32: 0>} : vector<8x16xi32>
    %1 = tpu.iota {dimensions = array<i32: 1>} : vector<8x16xi32>
    %c2_i32 = arith.constant 2 : i32
    %2 = vector.broadcast %c2_i32 : i32 to vector<8x16xi32>
    %3 = arith.muli %0, %2 : vector<8x16xi32>
    %c0_i32 = arith.constant 0 : i32
    %4 = vector.broadcast %c0_i32 : i32 to vector<8x16xi32>
    %5 = arith.addi %3, %4 : vector<8x16xi32>
    %6 = arith.cmpi eq, %1, %5 : vector<8x16xi32>
    %7 = arith.extui %6 : vector<8x16xi1> to vector<8x16xi32>
    %8 = arith.sitofp %7 : vector<8x16xi32> to vector<8x16xf32>
    %c2_i32_0 = arith.constant 2 : i32
    %9 = vector.broadcast %c2_i32_0 : i32 to vector<8x16xi32>
    %10 = arith.muli %0, %9 : vector<8x16xi32>
    %c1_i32 = arith.constant 1 : i32
    %11 = vector.broadcast %c1_i32 : i32 to vector<8x16xi32>
    %12 = arith.addi %10, %11 : vector<8x16xi32>
    %13 = arith.cmpi eq, %1, %12 : vector<8x16xi32>
    %14 = arith.extui %13 : vector<8x16xi1> to vector<8x16xi32>
    %15 = arith.sitofp %14 : vector<8x16xi32> to vector<8x16xf32>
    %c0 = arith.constant 0 : index
    %c0_1 = arith.constant 0 : index
    %c0_2 = arith.constant 0 : index
    %c0_3 = arith.constant 0 : index
    %c0_4 = arith.constant 0 : index
    %16 = vector.load %arg3[%c0, %c0_1, %c0_2, %c0_3, %c0_4] : memref<1x8x4x8x8xf32, #tpu.memory_space<vmem>>, vector<1x1x1x8x8xf32>
    %17 = vector.shape_cast %16 : vector<1x1x1x8x8xf32> to vector<8x8xf32>
    %cst = arith.constant dense<0.000000e+00> : vector<8x16xf32>
    %18 = tpu.matmul %17, %8, %cst {dimension_numbers = #tpu.dot_dimension_numbers<[1], [0], [0], [1], [0, 0, 1, 1], [], []>, precision = #tpu.contract_precision<fp32>} : vector<8x8xf32>, vector<8x16xf32>, vector<8x16xf32> -> vector<8x16xf32>
    %c0_5 = arith.constant 0 : index
    %c1 = arith.constant 1 : index
    %c0_6 = arith.constant 0 : index
    %c0_7 = arith.constant 0 : index
    %c0_8 = arith.constant 0 : index
    %19 = vector.load %arg3[%c0_5, %c1, %c0_6, %c0_7, %c0_8] : memref<1x8x4x8x8xf32, #tpu.memory_space<vmem>>, vector<1x1x1x8x8xf32>
    %20 = vector.shape_cast %19 : vector<1x1x1x8x8xf32> to vector<8x8xf32>
    %cst_9 = arith.constant dense<0.000000e+00> : vector<8x16xf32>
    %21 = tpu.matmul %20, %15, %cst_9 {dimension_numbers = #tpu.dot_dimension_numbers<[1], [0], [0], [1], [0, 0, 1, 1], [], []>, precision = #tpu.contract_precision<fp32>} : vector<8x8xf32>, vector<8x16xf32>, vector<8x16xf32> -> vector<8x16xf32>
    %22 = arith.addf %18, %21 : vector<8x16xf32>
    %c0_10 = arith.constant 0 : index
    %c0_11 = arith.constant 0 : index
    %c0_12 = arith.constant 0 : index
    %c0_13 = arith.constant 0 : index
    %c0_14 = arith.constant 0 : index
    %c0_15 = arith.constant 0 : index
    %23 = vector.load %arg4[%c0_10, %c0_11, %c0_12, %c0_13, %c0_14, %c0_15] : memref<1x1x4x2x8x32xf32, #tpu.memory_space<vmem>>, vector<1x1x1x1x8x16xf32>
    %24 = vector.shape_cast %23 : vector<1x1x1x1x8x16xf32> to vector<8x16xf32>
    %25 = vector.shape_cast %22 : vector<8x16xf32> to vector<1x1x1x1x8x16xf32>
    tpu.vector_store %arg4[%c0_10, %c0_11, %c0_12, %c0_13, %c0_14, %c0_15], %25 {strides = array<i32>} : memref<1x1x4x2x8x32xf32, #tpu.memory_space<vmem>>, vector<1x1x1x1x8x16xf32>,
    %c0_16 = arith.constant 0 : index
    %c2 = arith.constant 2 : index
    %c0_17 = arith.constant 0 : index
    %c0_18 = arith.constant 0 : index
    %c0_19 = arith.constant 0 : index
    %26 = vector.load %arg3[%c0_16, %c2, %c0_17, %c0_18, %c0_19] : memref<1x8x4x8x8xf32, #tpu.memory_space<vmem>>, vector<1x1x1x8x8xf32>
    %27 = vector.shape_cast %26 : vector<1x1x1x8x8xf32> to vector<8x8xf32>
    %cst_20 = arith.constant dense<0.000000e+00> : vector<8x16xf32>
    %28 = tpu.matmul %27, %8, %cst_20 {dimension_numbers = #tpu.dot_dimension_numbers<[1], [0], [0], [1], [0, 0, 1, 1], [], []>, precision = #tpu.contract_precision<fp32>} : vector<8x8xf32>, vector<8x16xf32>, vector<8x16xf32> -> vector<8x16xf32>
    %c0_21 = arith.constant 0 : index
    %c3 = arith.constant 3 : index
    %c0_22 = arith.constant 0 : index
    %c0_23 = arith.constant 0 : index
    %c0_24 = arith.constant 0 : index
    %29 = vector.load %arg3[%c0_21, %c3, %c0_22, %c0_23, %c0_24] : memref<1x8x4x8x8xf32, #tpu.memory_space<vmem>>, vector<1x1x1x8x8xf32>
    %30 = vector.shape_cast %29 : vector<1x1x1x8x8xf32> to vector<8x8xf32>
    %cst_25 = arith.constant dense<0.000000e+00> : vector<8x16xf32>
    %31 = tpu.matmul %30, %15, %cst_25 {dimension_numbers = #tpu.dot_dimension_numbers<[1], [0], [0], [1], [0, 0, 1, 1], [], []>, precision = #tpu.contract_precision<fp32>} : vector<8x8xf32>, vector<8x16xf32>, vector<8x16xf32> -> vector<8x16xf32>
    %32 = arith.addf %28, %31 : vector<8x16xf32>
    %c0_26 = arith.constant 0 : index
    %c0_27 = arith.constant 0 : index
    %c0_28 = arith.constant 0 : index
    %c0_29 = arith.constant 0 : index
    %c0_30 = arith.constant 0 : index
    %c16 = arith.constant 16 : index
    %33 = vector.load %arg4[%c0_26, %c0_27, %c0_28, %c0_29, %c0_30, %c16] : memref<1x1x4x2x8x32xf32, #tpu.memory_space<vmem>>, vector<1x1x1x1x8x16xf32>
    %34 = vector.shape_cast %33 : vector<1x1x1x1x8x16xf32> to vector<8x16xf32>
    %35 = vector.shape_cast %32 : vector<8x16xf32> to vector<1x1x1x1x8x16xf32>
    tpu.vector_store %arg4[%c0_26, %c0_27, %c0_28, %c0_29, %c0_30, %c16], %35 {strides = array<i32>} : memref<1x1x4x2x8x32xf32, #tpu.memory_space<vmem>>, vector<1x1x1x1x8x16xf32>,
    %c0_31 = arith.constant 0 : index
    %c4 = arith.constant 4 : index
    %c0_32 = arith.constant 0 : index
    %c0_33 = arith.constant 0 : index
    %c0_34 = arith.constant 0 : index
    %36 = vector.load %arg3[%c0_31, %c4, %c0_32, %c0_33, %c0_34] : memref<1x8x4x8x8xf32, #tpu.memory_space<vmem>>, vector<1x1x1x8x8xf32>
    %37 = vector.shape_cast %36 : vector<1x1x1x8x8xf32> to vector<8x8xf32>
    %cst_35 = arith.constant dense<0.000000e+00> : vector<8x16xf32>
    %38 = tpu.matmul %37, %8, %cst_35 {dimension_numbers = #tpu.dot_dimension_numbers<[1], [0], [0], [1], [0, 0, 1, 1], [], []>, precision = #tpu.contract_precision<fp32>} : vector<8x8xf32>, vector<8x16xf32>, vector<8x16xf32> -> vector<8x16xf32>
    %c0_36 = arith.constant 0 : index
    %c5 = arith.constant 5 : index
    %c0_37 = arith.constant 0 : index
    %c0_38 = arith.constant 0 : index
    %c0_39 = arith.constant 0 : index
    %39 = vector.load %arg3[%c0_36, %c5, %c0_37, %c0_38, %c0_39] : memref<1x8x4x8x8xf32, #tpu.memory_space<vmem>>, vector<1x1x1x8x8xf32>
    %40 = vector.shape_cast %39 : vector<1x1x1x8x8xf32> to vector<8x8xf32>
    %cst_40 = arith.constant dense<0.000000e+00> : vector<8x16xf32>
    %41 = tpu.matmul %40, %15, %cst_40 {dimension_numbers = #tpu.dot_dimension_numbers<[1], [0], [0], [1], [0, 0, 1, 1], [], []>, precision = #tpu.contract_precision<fp32>} : vector<8x8xf32>, vector<8x16xf32>, vector<8x16xf32> -> vector<8x16xf32>
    %42 = arith.addf %38, %41 : vector<8x16xf32>
    %c0_41 = arith.constant 0 : index
    %c0_42 = arith.constant 0 : index
    %c0_43 = arith.constant 0 : index
    %c1_44 = arith.constant 1 : index
    %c0_45 = arith.constant 0 : index
    %c0_46 = arith.constant 0 : index
    %43 = vector.load %arg4[%c0_41, %c0_42, %c0_43, %c1_44, %c0_45, %c0_46] : memref<1x1x4x2x8x32xf32, #tpu.memory_space<vmem>>, vector<1x1x1x1x8x16xf32>
    %44 = vector.shape_cast %43 : vector<1x1x1x1x8x16xf32> to vector<8x16xf32>
    %45 = vector.shape_cast %42 : vector<8x16xf32> to vector<1x1x1x1x8x16xf32>
    tpu.vector_store %arg4[%c0_41, %c0_42, %c0_43, %c1_44, %c0_45, %c0_46], %45 {strides = array<i32>} : memref<1x1x4x2x8x32xf32, #tpu.memory_space<vmem>>, vector<1x1x1x1x8x16xf32>,
    %c0_47 = arith.constant 0 : index
    %c6 = arith.constant 6 : index
    %c0_48 = arith.constant 0 : index
    %c0_49 = arith.constant 0 : index
    %c0_50 = arith.constant 0 : index
    %46 = vector.load %arg3[%c0_47, %c6, %c0_48, %c0_49, %c0_50] : memref<1x8x4x8x8xf32, #tpu.memory_space<vmem>>, vector<1x1x1x8x8xf32>
    %47 = vector.shape_cast %46 : vector<1x1x1x8x8xf32> to vector<8x8xf32>
    %cst_51 = arith.constant dense<0.000000e+00> : vector<8x16xf32>
    %48 = tpu.matmul %47, %8, %cst_51 {dimension_numbers = #tpu.dot_dimension_numbers<[1], [0], [0], [1], [0, 0, 1, 1], [], []>, precision = #tpu.contract_precision<fp32>} : vector<8x8xf32>, vector<8x16xf32>, vector<8x16xf32> -> vector<8x16xf32>
    %c0_52 = arith.constant 0 : index
    %c7 = arith.constant 7 : index
    %c0_53 = arith.constant 0 : index
    %c0_54 = arith.constant 0 : index
    %c0_55 = arith.constant 0 : index
    %49 = vector.load %arg3[%c0_52, %c7, %c0_53, %c0_54, %c0_55] : memref<1x8x4x8x8xf32, #tpu.memory_space<vmem>>, vector<1x1x1x8x8xf32>
    %50 = vector.shape_cast %49 : vector<1x1x1x8x8xf32> to vector<8x8xf32>
    %cst_56 = arith.constant dense<0.000000e+00> : vector<8x16xf32>
    %51 = tpu.matmul %50, %15, %cst_56 {dimension_numbers = #tpu.dot_dimension_numbers<[1], [0], [0], [1], [0, 0, 1, 1], [], []>, precision = #tpu.contract_precision<fp32>} : vector<8x8xf32>, vector<8x16xf32>, vector<8x16xf32> -> vector<8x16xf32>
    %52 = arith.addf %48, %51 : vector<8x16xf32>
    %c0_57 = arith.constant 0 : index
    %c0_58 = arith.constant 0 : index
    %c0_59 = arith.constant 0 : index
    %c1_60 = arith.constant 1 : index
    %c0_61 = arith.constant 0 : index
    %c16_62 = arith.constant 16 : index
    %53 = vector.load %arg4[%c0_57, %c0_58, %c0_59, %c1_60, %c0_61, %c16_62] : memref<1x1x4x2x8x32xf32, #tpu.memory_space<vmem>>, vector<1x1x1x1x8x16xf32>
    %54 = vector.shape_cast %53 : vector<1x1x1x1x8x16xf32> to vector<8x16xf32>
    %55 = vector.shape_cast %52 : vector<8x16xf32> to vector<1x1x1x1x8x16xf32>
    tpu.vector_store %arg4[%c0_57, %c0_58, %c0_59, %c1_60, %c0_61, %c16_62], %55 {strides = array<i32>} : memref<1x1x4x2x8x32xf32, #tpu.memory_space<vmem>>, vector<1x1x1x1x8x16xf32>,
    %c0_63 = arith.constant 0 : index
    %c0_64 = arith.constant 0 : index
    %c1_65 = arith.constant 1 : index
    %c0_66 = arith.constant 0 : index
    %c0_67 = arith.constant 0 : index
    %56 = vector.load %arg3[%c0_63, %c0_64, %c1_65, %c0_66, %c0_67] : memref<1x8x4x8x8xf32, #tpu.memory_space<vmem>>, vector<1x1x1x8x8xf32>
    %57 = vector.shape_cast %56 : vector<1x1x1x8x8xf32> to vector<8x8xf32>
    %cst_68 = arith.constant dense<0.000000e+00> : vector<8x16xf32>
    %58 = tpu.matmul %57, %8, %cst_68 {dimension_numbers = #tpu.dot_dimension_numbers<[1], [0], [0], [1], [0, 0, 1, 1], [], []>, precision = #tpu.contract_precision<fp32>} : vector<8x8xf32>, vector<8x16xf32>, vector<8x16xf32> -> vector<8x16xf32>
    %c0_69 = arith.constant 0 : index
    %c1_70 = arith.constant 1 : index
    %c1_71 = arith.constant 1 : index
    %c0_72 = arith.constant 0 : index
    %c0_73 = arith.constant 0 : index
    %59 = vector.load %arg3[%c0_69, %c1_70, %c1_71, %c0_72, %c0_73] : memref<1x8x4x8x8xf32, #tpu.memory_space<vmem>>, vector<1x1x1x8x8xf32>
    %60 = vector.shape_cast %59 : vector<1x1x1x8x8xf32> to vector<8x8xf32>
    %cst_74 = arith.constant dense<0.000000e+00> : vector<8x16xf32>
    %61 = tpu.matmul %60, %15, %cst_74 {dimension_numbers = #tpu.dot_dimension_numbers<[1], [0], [0], [1], [0, 0, 1, 1], [], []>, precision = #tpu.contract_precision<fp32>} : vector<8x8xf32>, vector<8x16xf32>, vector<8x16xf32> -> vector<8x16xf32>
    %62 = arith.addf %58, %61 : vector<8x16xf32>
    %c0_75 = arith.constant 0 : index
    %c0_76 = arith.constant 0 : index
    %c1_77 = arith.constant 1 : index
    %c0_78 = arith.constant 0 : index
    %c0_79 = arith.constant 0 : index
    %c0_80 = arith.constant 0 : index
    %63 = vector.load %arg4[%c0_75, %c0_76, %c1_77, %c0_78, %c0_79, %c0_80] : memref<1x1x4x2x8x32xf32, #tpu.memory_space<vmem>>, vector<1x1x1x1x8x16xf32>
    %64 = vector.shape_cast %63 : vector<1x1x1x1x8x16xf32> to vector<8x16xf32>
    %65 = vector.shape_cast %62 : vector<8x16xf32> to vector<1x1x1x1x8x16xf32>
    tpu.vector_store %arg4[%c0_75, %c0_76, %c1_77, %c0_78, %c0_79, %c0_80], %65 {strides = array<i32>} : memref<1x1x4x2x8x32xf32, #tpu.memory_space<vmem>>, vector<1x1x1x1x8x16xf32>,
    %c0_81 = arith.constant 0 : index
    %c2_82 = arith.constant 2 : index
    %c1_83 = arith.constant 1 : index
    %c0_84 = arith.constant 0 : index
    %c0_85 = arith.constant 0 : index
    %66 = vector.load %arg3[%c0_81, %c2_82, %c1_83, %c0_84, %c0_85] : memref<1x8x4x8x8xf32, #tpu.memory_space<vmem>>, vector<1x1x1x8x8xf32>
    %67 = vector.shape_cast %66 : vector<1x1x1x8x8xf32> to vector<8x8xf32>
    %cst_86 = arith.constant dense<0.000000e+00> : vector<8x16xf32>
    %68 = tpu.matmul %67, %8, %cst_86 {dimension_numbers = #tpu.dot_dimension_numbers<[1], [0], [0], [1], [0, 0, 1, 1], [], []>, precision = #tpu.contract_precision<fp32>} : vector<8x8xf32>, vector<8x16xf32>, vector<8x16xf32> -> vector<8x16xf32>
    %c0_87 = arith.constant 0 : index
    %c3_88 = arith.constant 3 : index
    %c1_89 = arith.constant 1 : index
    %c0_90 = arith.constant 0 : index
    %c0_91 = arith.constant 0 : index
    %69 = vector.load %arg3[%c0_87, %c3_88, %c1_89, %c0_90, %c0_91] : memref<1x8x4x8x8xf32, #tpu.memory_space<vmem>>, vector<1x1x1x8x8xf32>
    %70 = vector.shape_cast %69 : vector<1x1x1x8x8xf32> to vector<8x8xf32>
    %cst_92 = arith.constant dense<0.000000e+00> : vector<8x16xf32>
    %71 = tpu.matmul %70, %15, %cst_92 {dimension_numbers = #tpu.dot_dimension_numbers<[1], [0], [0], [1], [0, 0, 1, 1], [], []>, precision = #tpu.contract_precision<fp32>} : vector<8x8xf32>, vector<8x16xf32>, vector<8x16xf32> -> vector<8x16xf32>
    %72 = arith.addf %68, %71 : vector<8x16xf32>
    %c0_93 = arith.constant 0 : index
    %c0_94 = arith.constant 0 : index
    %c1_95 = arith.constant 1 : index
    %c0_96 = arith.constant 0 : index
    %c0_97 = arith.constant 0 : index
    %c16_98 = arith.constant 16 : index
    %73 = vector.load %arg4[%c0_93, %c0_94, %c1_95, %c0_96, %c0_97, %c16_98] : memref<1x1x4x2x8x32xf32, #tpu.memory_space<vmem>>, vector<1x1x1x1x8x16xf32>
    %74 = vector.shape_cast %73 : vector<1x1x1x1x8x16xf32> to vector<8x16xf32>
    %75 = vector.shape_cast %72 : vector<8x16xf32> to vector<1x1x1x1x8x16xf32>
    tpu.vector_store %arg4[%c0_93, %c0_94, %c1_95, %c0_96, %c0_97, %c16_98], %75 {strides = array<i32>} : memref<1x1x4x2x8x32xf32, #tpu.memory_space<vmem>>, vector<1x1x1x1x8x16xf32>,
    %c0_99 = arith.constant 0 : index
    %c4_100 = arith.constant 4 : index
    %c1_101 = arith.constant 1 : index
    %c0_102 = arith.constant 0 : index
    %c0_103 = arith.constant 0 : index
    %76 = vector.load %arg3[%c0_99, %c4_100, %c1_101, %c0_102, %c0_103] : memref<1x8x4x8x8xf32, #tpu.memory_space<vmem>>, vector<1x1x1x8x8xf32>
    %77 = vector.shape_cast %76 : vector<1x1x1x8x8xf32> to vector<8x8xf32>
    %cst_104 = arith.constant dense<0.000000e+00> : vector<8x16xf32>
    %78 = tpu.matmul %77, %8, %cst_104 {dimension_numbers = #tpu.dot_dimension_numbers<[1], [0], [0], [1], [0, 0, 1, 1], [], []>, precision = #tpu.contract_precision<fp32>} : vector<8x8xf32>, vector<8x16xf32>, vector<8x16xf32> -> vector<8x16xf32>
    %c0_105 = arith.constant 0 : index
    %c5_106 = arith.constant 5 : index
    %c1_107 = arith.constant 1 : index
    %c0_108 = arith.constant 0 : index
    %c0_109 = arith.constant 0 : index
    %79 = vector.load %arg3[%c0_105, %c5_106, %c1_107, %c0_108, %c0_109] : memref<1x8x4x8x8xf32, #tpu.memory_space<vmem>>, vector<1x1x1x8x8xf32>
    %80 = vector.shape_cast %79 : vector<1x1x1x8x8xf32> to vector<8x8xf32>
    %cst_110 = arith.constant dense<0.000000e+00> : vector<8x16xf32>
    %81 = tpu.matmul %80, %15, %cst_110 {dimension_numbers = #tpu.dot_dimension_numbers<[1], [0], [0], [1], [0, 0, 1, 1], [], []>, precision = #tpu.contract_precision<fp32>} : vector<8x8xf32>, vector<8x16xf32>, vector<8x16xf32> -> vector<8x16xf32>
    %82 = arith.addf %78, %81 : vector<8x16xf32>
    %c0_111 = arith.constant 0 : index
    %c0_112 = arith.constant 0 : index
    %c1_113 = arith.constant 1 : index
    %c1_114 = arith.constant 1 : index
    %c0_115 = arith.constant 0 : index
    %c0_116 = arith.constant 0 : index
    %83 = vector.load %arg4[%c0_111, %c0_112, %c1_113, %c1_114, %c0_115, %c0_116] : memref<1x1x4x2x8x32xf32, #tpu.memory_space<vmem>>, vector<1x1x1x1x8x16xf32>
    %84 = vector.shape_cast %83 : vector<1x1x1x1x8x16xf32> to vector<8x16xf32>
    %85 = vector.shape_cast %82 : vector<8x16xf32> to vector<1x1x1x1x8x16xf32>
    tpu.vector_store %arg4[%c0_111, %c0_112, %c1_113, %c1_114, %c0_115, %c0_116], %85 {strides = array<i32>} : memref<1x1x4x2x8x32xf32, #tpu.memory_space<vmem>>, vector<1x1x1x1x8x16xf32>,
    %c0_117 = arith.constant 0 : index
    %c6_118 = arith.constant 6 : index
    %c1_119 = arith.constant 1 : index
    %c0_120 = arith.constant 0 : index
    %c0_121 = arith.constant 0 : index
    %86 = vector.load %arg3[%c0_117, %c6_118, %c1_119, %c0_120, %c0_121] : memref<1x8x4x8x8xf32, #tpu.memory_space<vmem>>, vector<1x1x1x8x8xf32>
    %87 = vector.shape_cast %86 : vector<1x1x1x8x8xf32> to vector<8x8xf32>
    %cst_122 = arith.constant dense<0.000000e+00> : vector<8x16xf32>
    %88 = tpu.matmul %87, %8, %cst_122 {dimension_numbers = #tpu.dot_dimension_numbers<[1], [0], [0], [1], [0, 0, 1, 1], [], []>, precision = #tpu.contract_precision<fp32>} : vector<8x8xf32>, vector<8x16xf32>, vector<8x16xf32> -> vector<8x16xf32>
    %c0_123 = arith.constant 0 : index
    %c7_124 = arith.constant 7 : index
    %c1_125 = arith.constant 1 : index
    %c0_126 = arith.constant 0 : index
    %c0_127 = arith.constant 0 : index
    %89 = vector.load %arg3[%c0_123, %c7_124, %c1_125, %c0_126, %c0_127] : memref<1x8x4x8x8xf32, #tpu.memory_space<vmem>>, vector<1x1x1x8x8xf32>
    %90 = vector.shape_cast %89 : vector<1x1x1x8x8xf32> to vector<8x8xf32>
    %cst_128 = arith.constant dense<0.000000e+00> : vector<8x16xf32>
    %91 = tpu.matmul %90, %15, %cst_128 {dimension_numbers = #tpu.dot_dimension_numbers<[1], [0], [0], [1], [0, 0, 1, 1], [], []>, precision = #tpu.contract_precision<fp32>} : vector<8x8xf32>, vector<8x16xf32>, vector<8x16xf32> -> vector<8x16xf32>
    %92 = arith.addf %88, %91 : vector<8x16xf32>
    %c0_129 = arith.constant 0 : index
    %c0_130 = arith.constant 0 : index
    %c1_131 = arith.constant 1 : index
    %c1_132 = arith.constant 1 : index
    %c0_133 = arith.constant 0 : index
    %c16_134 = arith.constant 16 : index
    %93 = vector.load %arg4[%c0_129, %c0_130, %c1_131, %c1_132, %c0_133, %c16_134] : memref<1x1x4x2x8x32xf32, #tpu.memory_space<vmem>>, vector<1x1x1x1x8x16xf32>
    %94 = vector.shape_cast %93 : vector<1x1x1x1x8x16xf32> to vector<8x16xf32>
    %95 = vector.shape_cast %92 : vector<8x16xf32> to vector<1x1x1x1x8x16xf32>
    tpu.vector_store %arg4[%c0_129, %c0_130, %c1_131, %c1_132, %c0_133, %c16_134], %95 {strides = array<i32>} : memref<1x1x4x2x8x32xf32, #tpu.memory_space<vmem>>, vector<1x1x1x1x8x16xf32>,
    %c0_135 = arith.constant 0 : index
    %c0_136 = arith.constant 0 : index
    %c2_137 = arith.constant 2 : index
    %c0_138 = arith.constant 0 : index
    %c0_139 = arith.constant 0 : index
    %96 = vector.load %arg3[%c0_135, %c0_136, %c2_137, %c0_138, %c0_139] : memref<1x8x4x8x8xf32, #tpu.memory_space<vmem>>, vector<1x1x1x8x8xf32>
    %97 = vector.shape_cast %96 : vector<1x1x1x8x8xf32> to vector<8x8xf32>
    %cst_140 = arith.constant dense<0.000000e+00> : vector<8x16xf32>
    %98 = tpu.matmul %97, %8, %cst_140 {dimension_numbers = #tpu.dot_dimension_numbers<[1], [0], [0], [1], [0, 0, 1, 1], [], []>, precision = #tpu.contract_precision<fp32>} : vector<8x8xf32>, vector<8x16xf32>, vector<8x16xf32> -> vector<8x16xf32>
    %c0_141 = arith.constant 0 : index
    %c1_142 = arith.constant 1 : index
    %c2_143 = arith.constant 2 : index
    %c0_144 = arith.constant 0 : index
    %c0_145 = arith.constant 0 : index
    %99 = vector.load %arg3[%c0_141, %c1_142, %c2_143, %c0_144, %c0_145] : memref<1x8x4x8x8xf32, #tpu.memory_space<vmem>>, vector<1x1x1x8x8xf32>
    %100 = vector.shape_cast %99 : vector<1x1x1x8x8xf32> to vector<8x8xf32>
    %cst_146 = arith.constant dense<0.000000e+00> : vector<8x16xf32>
    %101 = tpu.matmul %100, %15, %cst_146 {dimension_numbers = #tpu.dot_dimension_numbers<[1], [0], [0], [1], [0, 0, 1, 1], [], []>, precision = #tpu.contract_precision<fp32>} : vector<8x8xf32>, vector<8x16xf32>, vector<8x16xf32> -> vector<8x16xf32>
    %102 = arith.addf %98, %101 : vector<8x16xf32>
    %c0_147 = arith.constant 0 : index
    %c0_148 = arith.constant 0 : index
    %c2_149 = arith.constant 2 : index
    %c0_150 = arith.constant 0 : index
    %c0_151 = arith.constant 0 : index
    %c0_152 = arith.constant 0 : index
    %103 = vector.load %arg4[%c0_147, %c0_148, %c2_149, %c0_150, %c0_151, %c0_152] : memref<1x1x4x2x8x32xf32, #tpu.memory_space<vmem>>, vector<1x1x1x1x8x16xf32>
    %104 = vector.shape_cast %103 : vector<1x1x1x1x8x16xf32> to vector<8x16xf32>
    %105 = vector.shape_cast %102 : vector<8x16xf32> to vector<1x1x1x1x8x16xf32>
    tpu.vector_store %arg4[%c0_147, %c0_148, %c2_149, %c0_150, %c0_151, %c0_152], %105 {strides = array<i32>} : memref<1x1x4x2x8x32xf32, #tpu.memory_space<vmem>>, vector<1x1x1x1x8x16xf32>,
    %c0_153 = arith.constant 0 : index
    %c2_154 = arith.constant 2 : index
    %c2_155 = arith.constant 2 : index
    %c0_156 = arith.constant 0 : index
    %c0_157 = arith.constant 0 : index
    %106 = vector.load %arg3[%c0_153, %c2_154, %c2_155, %c0_156, %c0_157] : memref<1x8x4x8x8xf32, #tpu.memory_space<vmem>>, vector<1x1x1x8x8xf32>
    %107 = vector.shape_cast %106 : vector<1x1x1x8x8xf32> to vector<8x8xf32>
    %cst_158 = arith.constant dense<0.000000e+00> : vector<8x16xf32>
    %108 = tpu.matmul %107, %8, %cst_158 {dimension_numbers = #tpu.dot_dimension_numbers<[1], [0], [0], [1], [0, 0, 1, 1], [], []>, precision = #tpu.contract_precision<fp32>} : vector<8x8xf32>, vector<8x16xf32>, vector<8x16xf32> -> vector<8x16xf32>
    %c0_159 = arith.constant 0 : index
    %c3_160 = arith.constant 3 : index
    %c2_161 = arith.constant 2 : index
    %c0_162 = arith.constant 0 : index
    %c0_163 = arith.constant 0 : index
    %109 = vector.load %arg3[%c0_159, %c3_160, %c2_161, %c0_162, %c0_163] : memref<1x8x4x8x8xf32, #tpu.memory_space<vmem>>, vector<1x1x1x8x8xf32>
    %110 = vector.shape_cast %109 : vector<1x1x1x8x8xf32> to vector<8x8xf32>
    %cst_164 = arith.constant dense<0.000000e+00> : vector<8x16xf32>
    %111 = tpu.matmul %110, %15, %cst_164 {dimension_numbers = #tpu.dot_dimension_numbers<[1], [0], [0], [1], [0, 0, 1, 1], [], []>, precision = #tpu.contract_precision<fp32>} : vector<8x8xf32>, vector<8x16xf32>, vector<8x16xf32> -> vector<8x16xf32>
    %112 = arith.addf %108, %111 : vector<8x16xf32>
    %c0_165 = arith.constant 0 : index
    %c0_166 = arith.constant 0 : index
    %c2_167 = arith.constant 2 : index
    %c0_168 = arith.constant 0 : index
    %c0_169 = arith.constant 0 : index
    %c16_170 = arith.constant 16 : index
    %113 = vector.load %arg4[%c0_165, %c0_166, %c2_167, %c0_168, %c0_169, %c16_170] : memref<1x1x4x2x8x32xf32, #tpu.memory_space<vmem>>, vector<1x1x1x1x8x16xf32>
    %114 = vector.shape_cast %113 : vector<1x1x1x1x8x16xf32> to vector<8x16xf32>
    %115 = vector.shape_cast %112 : vector<8x16xf32> to vector<1x1x1x1x8x16xf32>
    tpu.vector_store %arg4[%c0_165, %c0_166, %c2_167, %c0_168, %c0_169, %c16_170], %115 {strides = array<i32>} : memref<1x1x4x2x8x32xf32, #tpu.memory_space<vmem>>, vector<1x1x1x1x8x16xf32>,
    %c0_171 = arith.constant 0 : index
    %c4_172 = arith.constant 4 : index
    %c2_173 = arith.constant 2 : index
    %c0_174 = arith.constant 0 : index
    %c0_175 = arith.constant 0 : index
    %116 = vector.load %arg3[%c0_171, %c4_172, %c2_173, %c0_174, %c0_175] : memref<1x8x4x8x8xf32, #tpu.memory_space<vmem>>, vector<1x1x1x8x8xf32>
    %117 = vector.shape_cast %116 : vector<1x1x1x8x8xf32> to vector<8x8xf32>
    %cst_176 = arith.constant dense<0.000000e+00> : vector<8x16xf32>
    %118 = tpu.matmul %117, %8, %cst_176 {dimension_numbers = #tpu.dot_dimension_numbers<[1], [0], [0], [1], [0, 0, 1, 1], [], []>, precision = #tpu.contract_precision<fp32>} : vector<8x8xf32>, vector<8x16xf32>, vector<8x16xf32> -> vector<8x16xf32>
    %c0_177 = arith.constant 0 : index
    %c5_178 = arith.constant 5 : index
    %c2_179 = arith.constant 2 : index
    %c0_180 = arith.constant 0 : index
    %c0_181 = arith.constant 0 : index
    %119 = vector.load %arg3[%c0_177, %c5_178, %c2_179, %c0_180, %c0_181] : memref<1x8x4x8x8xf32, #tpu.memory_space<vmem>>, vector<1x1x1x8x8xf32>
    %120 = vector.shape_cast %119 : vector<1x1x1x8x8xf32> to vector<8x8xf32>
    %cst_182 = arith.constant dense<0.000000e+00> : vector<8x16xf32>
    %121 = tpu.matmul %120, %15, %cst_182 {dimension_numbers = #tpu.dot_dimension_numbers<[1], [0], [0], [1], [0, 0, 1, 1], [], []>, precision = #tpu.contract_precision<fp32>} : vector<8x8xf32>, vector<8x16xf32>, vector<8x16xf32> -> vector<8x16xf32>
    %122 = arith.addf %118, %121 : vector<8x16xf32>
    %c0_183 = arith.constant 0 : index
    %c0_184 = arith.constant 0 : index
    %c2_185 = arith.constant 2 : index
    %c1_186 = arith.constant 1 : index
    %c0_187 = arith.constant 0 : index
    %c0_188 = arith.constant 0 : index
    %123 = vector.load %arg4[%c0_183, %c0_184, %c2_185, %c1_186, %c0_187, %c0_188] : memref<1x1x4x2x8x32xf32, #tpu.memory_space<vmem>>, vector<1x1x1x1x8x16xf32>
    %124 = vector.shape_cast %123 : vector<1x1x1x1x8x16xf32> to vector<8x16xf32>
    %125 = vector.shape_cast %122 : vector<8x16xf32> to vector<1x1x1x1x8x16xf32>
    tpu.vector_store %arg4[%c0_183, %c0_184, %c2_185, %c1_186, %c0_187, %c0_188], %125 {strides = array<i32>} : memref<1x1x4x2x8x32xf32, #tpu.memory_space<vmem>>, vector<1x1x1x1x8x16xf32>,
    %c0_189 = arith.constant 0 : index
    %c6_190 = arith.constant 6 : index
    %c2_191 = arith.constant 2 : index
    %c0_192 = arith.constant 0 : index
    %c0_193 = arith.constant 0 : index
    %126 = vector.load %arg3[%c0_189, %c6_190, %c2_191, %c0_192, %c0_193] : memref<1x8x4x8x8xf32, #tpu.memory_space<vmem>>, vector<1x1x1x8x8xf32>
    %127 = vector.shape_cast %126 : vector<1x1x1x8x8xf32> to vector<8x8xf32>
    %cst_194 = arith.constant dense<0.000000e+00> : vector<8x16xf32>
    %128 = tpu.matmul %127, %8, %cst_194 {dimension_numbers = #tpu.dot_dimension_numbers<[1], [0], [0], [1], [0, 0, 1, 1], [], []>, precision = #tpu.contract_precision<fp32>} : vector<8x8xf32>, vector<8x16xf32>, vector<8x16xf32> -> vector<8x16xf32>
    %c0_195 = arith.constant 0 : index
    %c7_196 = arith.constant 7 : index
    %c2_197 = arith.constant 2 : index
    %c0_198 = arith.constant 0 : index
    %c0_199 = arith.constant 0 : index
    %129 = vector.load %arg3[%c0_195, %c7_196, %c2_197, %c0_198, %c0_199] : memref<1x8x4x8x8xf32, #tpu.memory_space<vmem>>, vector<1x1x1x8x8xf32>
    %130 = vector.shape_cast %129 : vector<1x1x1x8x8xf32> to vector<8x8xf32>
    %cst_200 = arith.constant dense<0.000000e+00> : vector<8x16xf32>
    %131 = tpu.matmul %130, %15, %cst_200 {dimension_numbers = #tpu.dot_dimension_numbers<[1], [0], [0], [1], [0, 0, 1, 1], [], []>, precision = #tpu.contract_precision<fp32>} : vector<8x8xf32>, vector<8x16xf32>, vector<8x16xf32> -> vector<8x16xf32>
    %132 = arith.addf %128, %131 : vector<8x16xf32>
    %c0_201 = arith.constant 0 : index
    %c0_202 = arith.constant 0 : index
    %c2_203 = arith.constant 2 : index
    %c1_204 = arith.constant 1 : index
    %c0_205 = arith.constant 0 : index
    %c16_206 = arith.constant 16 : index
    %133 = vector.load %arg4[%c0_201, %c0_202, %c2_203, %c1_204, %c0_205, %c16_206] : memref<1x1x4x2x8x32xf32, #tpu.memory_space<vmem>>, vector<1x1x1x1x8x16xf32>
    %134 = vector.shape_cast %133 : vector<1x1x1x1x8x16xf32> to vector<8x16xf32>
    %135 = vector.shape_cast %132 : vector<8x16xf32> to vector<1x1x1x1x8x16xf32>
    tpu.vector_store %arg4[%c0_201, %c0_202, %c2_203, %c1_204, %c0_205, %c16_206], %135 {strides = array<i32>} : memref<1x1x4x2x8x32xf32, #tpu.memory_space<vmem>>, vector<1x1x1x1x8x16xf32>,
    %c0_207 = arith.constant 0 : index
    %c0_208 = arith.constant 0 : index
    %c3_209 = arith.constant 3 : index
    %c0_210 = arith.constant 0 : index
    %c0_211 = arith.constant 0 : index
    %136 = vector.load %arg3[%c0_207, %c0_208, %c3_209, %c0_210, %c0_211] : memref<1x8x4x8x8xf32, #tpu.memory_space<vmem>>, vector<1x1x1x8x8xf32>
    %137 = vector.shape_cast %136 : vector<1x1x1x8x8xf32> to vector<8x8xf32>
    %cst_212 = arith.constant dense<0.000000e+00> : vector<8x16xf32>
    %138 = tpu.matmul %137, %8, %cst_212 {dimension_numbers = #tpu.dot_dimension_numbers<[1], [0], [0], [1], [0, 0, 1, 1], [], []>, precision = #tpu.contract_precision<fp32>} : vector<8x8xf32>, vector<8x16xf32>, vector<8x16xf32> -> vector<8x16xf32>
    %c0_213 = arith.constant 0 : index
    %c1_214 = arith.constant 1 : index
    %c3_215 = arith.constant 3 : index
    %c0_216 = arith.constant 0 : index
    %c0_217 = arith.constant 0 : index
    %139 = vector.load %arg3[%c0_213, %c1_214, %c3_215, %c0_216, %c0_217] : memref<1x8x4x8x8xf32, #tpu.memory_space<vmem>>, vector<1x1x1x8x8xf32>
    %140 = vector.shape_cast %139 : vector<1x1x1x8x8xf32> to vector<8x8xf32>
    %cst_218 = arith.constant dense<0.000000e+00> : vector<8x16xf32>
    %141 = tpu.matmul %140, %15, %cst_218 {dimension_numbers = #tpu.dot_dimension_numbers<[1], [0], [0], [1], [0, 0, 1, 1], [], []>, precision = #tpu.contract_precision<fp32>} : vector<8x8xf32>, vector<8x16xf32>, vector<8x16xf32> -> vector<8x16xf32>
    %142 = arith.addf %138, %141 : vector<8x16xf32>
    %c0_219 = arith.constant 0 : index
    %c0_220 = arith.constant 0 : index
    %c3_221 = arith.constant 3 : index
    %c0_222 = arith.constant 0 : index
    %c0_223 = arith.constant 0 : index
    %c0_224 = arith.constant 0 : index
    %143 = vector.load %arg4[%c0_219, %c0_220, %c3_221, %c0_222, %c0_223, %c0_224] : memref<1x1x4x2x8x32xf32, #tpu.memory_space<vmem>>, vector<1x1x1x1x8x16xf32>
    %144 = vector.shape_cast %143 : vector<1x1x1x1x8x16xf32> to vector<8x16xf32>
    %145 = vector.shape_cast %142 : vector<8x16xf32> to vector<1x1x1x1x8x16xf32>
    tpu.vector_store %arg4[%c0_219, %c0_220, %c3_221, %c0_222, %c0_223, %c0_224], %145 {strides = array<i32>} : memref<1x1x4x2x8x32xf32, #tpu.memory_space<vmem>>, vector<1x1x1x1x8x16xf32>,
    %c0_225 = arith.constant 0 : index
    %c2_226 = arith.constant 2 : index
    %c3_227 = arith.constant 3 : index
    %c0_228 = arith.constant 0 : index
    %c0_229 = arith.constant 0 : index
    %146 = vector.load %arg3[%c0_225, %c2_226, %c3_227, %c0_228, %c0_229] : memref<1x8x4x8x8xf32, #tpu.memory_space<vmem>>, vector<1x1x1x8x8xf32>
    %147 = vector.shape_cast %146 : vector<1x1x1x8x8xf32> to vector<8x8xf32>
    %cst_230 = arith.constant dense<0.000000e+00> : vector<8x16xf32>
    %148 = tpu.matmul %147, %8, %cst_230 {dimension_numbers = #tpu.dot_dimension_numbers<[1], [0], [0], [1], [0, 0, 1, 1], [], []>, precision = #tpu.contract_precision<fp32>} : vector<8x8xf32>, vector<8x16xf32>, vector<8x16xf32> -> vector<8x16xf32>
    %c0_231 = arith.constant 0 : index
    %c3_232 = arith.constant 3 : index
    %c3_233 = arith.constant 3 : index
    %c0_234 = arith.constant 0 : index
    %c0_235 = arith.constant 0 : index
    %149 = vector.load %arg3[%c0_231, %c3_232, %c3_233, %c0_234, %c0_235] : memref<1x8x4x8x8xf32, #tpu.memory_space<vmem>>, vector<1x1x1x8x8xf32>
    %150 = vector.shape_cast %149 : vector<1x1x1x8x8xf32> to vector<8x8xf32>
    %cst_236 = arith.constant dense<0.000000e+00> : vector<8x16xf32>
    %151 = tpu.matmul %150, %15, %cst_236 {dimension_numbers = #tpu.dot_dimension_numbers<[1], [0], [0], [1], [0, 0, 1, 1], [], []>, precision = #tpu.contract_precision<fp32>} : vector<8x8xf32>, vector<8x16xf32>, vector<8x16xf32> -> vector<8x16xf32>
    %152 = arith.addf %148, %151 : vector<8x16xf32>
    %c0_237 = arith.constant 0 : index
    %c0_238 = arith.constant 0 : index
    %c3_239 = arith.constant 3 : index
    %c0_240 = arith.constant 0 : index
    %c0_241 = arith.constant 0 : index
    %c16_242 = arith.constant 16 : index
    %153 = vector.load %arg4[%c0_237, %c0_238, %c3_239, %c0_240, %c0_241, %c16_242] : memref<1x1x4x2x8x32xf32, #tpu.memory_space<vmem>>, vector<1x1x1x1x8x16xf32>
    %154 = vector.shape_cast %153 : vector<1x1x1x1x8x16xf32> to vector<8x16xf32>
    %155 = vector.shape_cast %152 : vector<8x16xf32> to vector<1x1x1x1x8x16xf32>
    tpu.vector_store %arg4[%c0_237, %c0_238, %c3_239, %c0_240, %c0_241, %c16_242], %155 {strides = array<i32>} : memref<1x1x4x2x8x32xf32, #tpu.memory_space<vmem>>, vector<1x1x1x1x8x16xf32>,
    %c0_243 = arith.constant 0 : index
    %c4_244 = arith.constant 4 : index
    %c3_245 = arith.constant 3 : index
    %c0_246 = arith.constant 0 : index
    %c0_247 = arith.constant 0 : index
    %156 = vector.load %arg3[%c0_243, %c4_244, %c3_245, %c0_246, %c0_247] : memref<1x8x4x8x8xf32, #tpu.memory_space<vmem>>, vector<1x1x1x8x8xf32>
    %157 = vector.shape_cast %156 : vector<1x1x1x8x8xf32> to vector<8x8xf32>
    %cst_248 = arith.constant dense<0.000000e+00> : vector<8x16xf32>
    %158 = tpu.matmul %157, %8, %cst_248 {dimension_numbers = #tpu.dot_dimension_numbers<[1], [0], [0], [1], [0, 0, 1, 1], [], []>, precision = #tpu.contract_precision<fp32>} : vector<8x8xf32>, vector<8x16xf32>, vector<8x16xf32> -> vector<8x16xf32>
    %c0_249 = arith.constant 0 : index
    %c5_250 = arith.constant 5 : index
    %c3_251 = arith.constant 3 : index
    %c0_252 = arith.constant 0 : index
    %c0_253 = arith.constant 0 : index
    %159 = vector.load %arg3[%c0_249, %c5_250, %c3_251, %c0_252, %c0_253] : memref<1x8x4x8x8xf32, #tpu.memory_space<vmem>>, vector<1x1x1x8x8xf32>
    %160 = vector.shape_cast %159 : vector<1x1x1x8x8xf32> to vector<8x8xf32>
    %cst_254 = arith.constant dense<0.000000e+00> : vector<8x16xf32>
    %161 = tpu.matmul %160, %15, %cst_254 {dimension_numbers = #tpu.dot_dimension_numbers<[1], [0], [0], [1], [0, 0, 1, 1], [], []>, precision = #tpu.contract_precision<fp32>} : vector<8x8xf32>, vector<8x16xf32>, vector<8x16xf32> -> vector<8x16xf32>
    %162 = arith.addf %158, %161 : vector<8x16xf32>
    %c0_255 = arith.constant 0 : index
    %c0_256 = arith.constant 0 : index
    %c3_257 = arith.constant 3 : index
    %c1_258 = arith.constant 1 : index
    %c0_259 = arith.constant 0 : index
    %c0_260 = arith.constant 0 : index
    %163 = vector.load %arg4[%c0_255, %c0_256, %c3_257, %c1_258, %c0_259, %c0_260] : memref<1x1x4x2x8x32xf32, #tpu.memory_space<vmem>>, vector<1x1x1x1x8x16xf32>
    %164 = vector.shape_cast %163 : vector<1x1x1x1x8x16xf32> to vector<8x16xf32>
    %165 = vector.shape_cast %162 : vector<8x16xf32> to vector<1x1x1x1x8x16xf32>
    tpu.vector_store %arg4[%c0_255, %c0_256, %c3_257, %c1_258, %c0_259, %c0_260], %165 {strides = array<i32>} : memref<1x1x4x2x8x32xf32, #tpu.memory_space<vmem>>, vector<1x1x1x1x8x16xf32>,
    %c0_261 = arith.constant 0 : index
    %c6_262 = arith.constant 6 : index
    %c3_263 = arith.constant 3 : index
    %c0_264 = arith.constant 0 : index
    %c0_265 = arith.constant 0 : index
    %166 = vector.load %arg3[%c0_261, %c6_262, %c3_263, %c0_264, %c0_265] : memref<1x8x4x8x8xf32, #tpu.memory_space<vmem>>, vector<1x1x1x8x8xf32>
    %167 = vector.shape_cast %166 : vector<1x1x1x8x8xf32> to vector<8x8xf32>
    %cst_266 = arith.constant dense<0.000000e+00> : vector<8x16xf32>
    %168 = tpu.matmul %167, %8, %cst_266 {dimension_numbers = #tpu.dot_dimension_numbers<[1], [0], [0], [1], [0, 0, 1, 1], [], []>, precision = #tpu.contract_precision<fp32>} : vector<8x8xf32>, vector<8x16xf32>, vector<8x16xf32> -> vector<8x16xf32>
    %c0_267 = arith.constant 0 : index
    %c7_268 = arith.constant 7 : index
    %c3_269 = arith.constant 3 : index
    %c0_270 = arith.constant 0 : index
    %c0_271 = arith.constant 0 : index
    %169 = vector.load %arg3[%c0_267, %c7_268, %c3_269, %c0_270, %c0_271] : memref<1x8x4x8x8xf32, #tpu.memory_space<vmem>>, vector<1x1x1x8x8xf32>
    %170 = vector.shape_cast %169 : vector<1x1x1x8x8xf32> to vector<8x8xf32>
    %cst_272 = arith.constant dense<0.000000e+00> : vector<8x16xf32>
    %171 = tpu.matmul %170, %15, %cst_272 {dimension_numbers = #tpu.dot_dimension_numbers<[1], [0], [0], [1], [0, 0, 1, 1], [], []>, precision = #tpu.contract_precision<fp32>} : vector<8x8xf32>, vector<8x16xf32>, vector<8x16xf32> -> vector<8x16xf32>
    %172 = arith.addf %168, %171 : vector<8x16xf32>
    %c0_273 = arith.constant 0 : index
    %c0_274 = arith.constant 0 : index
    %c3_275 = arith.constant 3 : index
    %c1_276 = arith.constant 1 : index
    %c0_277 = arith.constant 0 : index
    %c16_278 = arith.constant 16 : index
    %173 = vector.load %arg4[%c0_273, %c0_274, %c3_275, %c1_276, %c0_277, %c16_278] : memref<1x1x4x2x8x32xf32, #tpu.memory_space<vmem>>, vector<1x1x1x1x8x16xf32>
    %174 = vector.shape_cast %173 : vector<1x1x1x1x8x16xf32> to vector<8x16xf32>
    %175 = vector.shape_cast %172 : vector<8x16xf32> to vector<1x1x1x1x8x16xf32>
    tpu.vector_store %arg4[%c0_273, %c0_274, %c3_275, %c1_276, %c0_277, %c16_278], %175 {strides = array<i32>} : memref<1x1x4x2x8x32xf32, #tpu.memory_space<vmem>>, vector<1x1x1x1x8x16xf32>,
    return
  }
  func.func @transform_0(%arg0: i32, %arg1: i32, %arg2: i32) -> (i32, i32, i32, i32, i32) {
    %c0_i32 = arith.constant 0 : i32
    %c0_i32_0 = arith.constant 0 : i32
    %c0_i32_1 = arith.constant 0 : i32
    return %arg0, %arg1, %arg2, %c0_i32, %c0_i32_0 : i32, i32, i32, i32, i32
  }
  func.func @transform_1(%arg0: i32, %arg1: i32, %arg2: i32) -> (i32, i32, i32, i32, i32, i32) {
    %c0_i32 = arith.constant 0 : i32
    %c0_i32_0 = arith.constant 0 : i32
    %c0_i32_1 = arith.constant 0 : i32
    %c0_i32_2 = arith.constant 0 : i32
    return %arg0, %arg1, %arg2, %c0_i32, %c0_i32_0, %c0_i32_1 : i32, i32, i32, i32, i32, i32
  }
}

</mosaic_0001>

<bundles_post_ra>
// kernel: tpu_custom_call.1
= control target key start
LH: loop header
LB: loop body
LE: loop exit
PB: predicated region body
PF: predicated region fallthrough
CT: control target
= control target key end

     0   :  { %6 = vsyncpa [#allocation3], 0  ;;  %s18288_s0 = inlined_call_operand.vmem [shape: f32[2,16,4,8,8], index: 0, kind: input, shape index: {}]   ;;  %s18289_s1 = inlined_call_operand.hbm [shape: f32[2,2,4,2,8,32], index: 1, kind: output, shape index: {}]  }
   0x1   :  { %8 = vsyncpa [#allocation3 + $0x1], 0  ;;  %s16832_s6 = smov 0   ;;  %s16834_s7 = smov 0  }
   0x2   :  { %s16836_s8 = smov 0   ;;  %s16838_s9 = smov 0  }
   0x3   :  { %s16840_s10 = smov 0   ;;  %s16842_s11 = smov 0  }
   0x4   :  { %s16844_s12 = smov 0   ;;  %s16846_s13 = smov 0  }
   0x5 LB: > { %s14787_s14 = sadd.s32 4294967295, %s16813_s13   ;;  %s14788_s15 = sadd.s32 4294967294, %s16813_s13   ;;  %s16813_s13 = sphi %s16846_s13, %s14_s13   ;;  %s16809_s12 = sphi %s16844_s12, %s18302_s12   ;;  %s16805_s11 = sphi %s16842_s11, %s18301_s11   ;;  %s16801_s10 = sphi %s16840_s10, %s18300_s10   ;;  %s16797_s9 = sphi %s16838_s9, %s18299_s9   ;;  %s16793_s8 = sphi %s16836_s8, %s18298_s8   ;;  %s16789_s7 = sphi %s16834_s7, %s18297_s7   ;;  %s16785_s6 = sphi %s16832_s6, %s18296_s6  }
   0x6   : > { %s29_s16 = sadd.s32 1, %s16805_s11  ;;  %s33_s17 = sadd.s32 1, %s16809_s12 }
   0x7   : > { %p31_p0 = scmp.ge.s32.totalorder %s29_s16, 2  ;;  %p84_p1 = scmp.ne.s32.totalorder %s16793_s8, %s16789_s7 }
   0x8   : > { %p85_p2 = scmp.eq.s32.totalorder %s14787_s14, 3  ;;  %p90_p5 = scmp.ne.s32.totalorder %s16789_s7, %s16785_s6 }
   0x9   : > { %s18304_s16 = smov (%p31_p0, %s29_s16), 0  ;;  %s18306_s17 = smov (!%p31_p0, %s33_s17), %s16809_s12 }
   0xa   : > { %s68_s18 = ssub.s32 %s16805_s11, %s18304_s16  ;;  %p16883_p3 = por %p85_p2, %p84_p1 }
   0xb   : > { %p35_p4 = scmp.ge.s32.totalorder %s18306_s17, 2  ;;  %p91_p6 = scmp.eq.s32.totalorder %s14788_s15, 3 }
   0xc   : > { %p14791_p7 = scmp.ge.s32.totalorder %s16813_s13, 1  ;;  %p128_p9 = scmp.lt.s32.totalorder %s16813_s13, 5 }
   0xd   : > { %s18308_s17 = smov (%p35_p4, %s18306_s17), 0  ;;  %p16892_p8 = por %p91_p6, %p90_p5 }
   0xe   : > { %s67_s21 = ssub.s32 %s16809_s12, %s18308_s17  ;;  %s74_s22 = sadd.s32 1, %s16793_s8 }
   0xf   : > { %s69_s23 = sor.u32 %s68_s18, %s67_s21  ;;  %p129_p10 = pnand %p14791_p7, %p128_p9 }
  0x10   : > { %p72_p11 = scmp.eq.s32.totalorder %s69_s23, 0  ;;  %v174_v0 = vlaneseq (!%p129_p10)  ;;  %s16904_s25 = sshll.u32 (!%p129_p10), %s16797_s9, 3  ;;  %v16815_v1 = vmov (!%p129_p10), 0.0   ;;  %vm16816_vm0 = vmmov (!%p129_p10), 0   ;;  %vm189_vm1 = vcmask (!%p129_p10), 64512  }
  0x11   : > { %132 = sbr.rel (%p129_p10) target bundleno = 1117 (0x45d), region = 24  ;;  %p159_p12 = scmp.lt.s32.totalorder (!%p129_p10), %s16801_s10, 1  ;;  %15390 = vmatprep.subr.mxu1 (!%p129_p10), %v16815_v1  ;;  %15392 = vmatprep.mubr.msk.f32.mxu1 (!%p129_p10), %vm16816_vm0, %v16815_v1  ;;  %v16817_v7 = vmov (!%p129_p10), 1.0   ;;  %vm1088_vm4 = vcmask (!%p129_p10), 130048   ;;  %vm1996_vm5 = vcmask (!%p129_p10), 261248  }
  0x12   : > { %s16901_s24 = scalar_select %p72_p11, %s16793_s8, %s74_s22  }
  0x13   : > { %p161_p13 = scmp.lt.s32.totalorder (!%p129_p10), %s16904_s25, 15  ;;  %v16911_v2 = vshrl.u32 (!%p129_p10), %v174_v0, 7  ;;  %15330 = vmatprep.subr.mxu0 (!%p129_p10), %v16815_v1  ;;  %15332 = vmatprep.mubr.msk.f32.mxu0 (!%p129_p10), %vm16816_vm0, %v16815_v1  ;;  %v16918_v3 = vand.u32 (!%p129_p10), 127, %v174_v0  ;;  %s154_s9 = sand.u32 (!%p129_p10), 1, %s16789_s7  }
  0x14   : > { %s14792_s14 = sshll.u32 (!%p129_p10), %s154_s9, 6  ;;  %s16818_s15 = smov (!%p129_p10), 16  }
  0x15   : > { %v178_v4 = vmul.u32 (!%p129_p10), 2, %v16911_v2  ;;  %s17478_s18 = scalar_lea.vmem (!%p129_p10), [#allocation2], %s14792_s14  ;;  %s14942_s21 = sshll.u32 (!%p129_p10), %s16801_s10, 4 }
  0x16   : > { %s14691_s22 = sadd.s32 (!%p129_p10), %s14942_s21, %s16904_s25 }
  0x17   : > { %v182_v5 = vadd.s32 (!%p129_p10), 1, %v178_v4  ;;  %vm17005_vm3 = vcmp.eq.s32.totalorder (!%p129_p10), %v16918_v3, %v178_v4  ;;  %s14943_s23 = sshll.u32 (!%p129_p10), %s14691_s22, 7 }
  0x18   : > { %s160_s26 = scalar_select %p159_p12, %s16801_s10, 1  ;;  %v14797_v34 = vsel %vm17005_vm3, 1.0, %v16815_v1 }
  0x19   : > { %s162_s27 = scalar_select %p161_p13, %s16904_s25, 15  ;;  %vm16924_vm2 = vcmp.eq.s32.totalorder %v16918_v3, %v182_v5  ;;  %v17028_v37 = vsub.f32 %v14797_v34, %v14797_v34 }
  0x1a   : > { %s14795_s28 = sshll.u32 %s160_s26, 6  ;;  %15391 = vmatpush3.msk.msra.mxu1 %vm16924_vm2, %v16817_v7  ;;  %v14798_v9 = vsel %vm16924_vm2, 1.0, %v16815_v1  ;;  %15331 = vmatpush3.msk.msra.mxu0 %vm16924_vm2, %v16817_v7  ;;  %s14694_s26 = sshll.u32 %s17478_s18, 4  ;;  %s18230_s26 = int_to_ptr.vmem [resolvable:$true] %s14694_s26 }
  0x1b   : > { %s14794_s29 = sshll.u32 %s162_s27, 2  ;;  %15395 = vmatprep.subr.mxu1 %v16815_v1  ;;  %v16946_v12 = vsub.f32 %v14798_v9, %v14798_v9  ;;  %15335 = vmatprep.subr.mxu0 %v16815_v1  ;;  %v17038_v40 = vand.u32 4294901760, %v17028_v37  ;;  %s16719_s10 = scalar_lea.vmem %s18230_s26, 1024 }
  0x1c   : > { %s168_s30 = sadd.s32 %s14795_s28, %s14794_s29  ;;  %s18228_s29 = scalar_lea.hbm %s18289_s1, %s14943_s23 }
  0x1d   : > { %s14796_s2 = sshll.u32 %s168_s30, 3  ;;  %v16955_v16 = vand.u32 4294901760, %v16946_v12  ;;  %v722_v43 = vsub.f32 %v17028_v37, %v17038_v40  ;;  %s18236_s30 = scalar_lea.sflag [#allocation3], %s154_s9 }
  0x1e   : > { %s16931_s5 = scalar_lea.vmem %s18288_s0, %s14796_s2  ;;  %p16720_p0 = scmp.ne.s32.totalorder %s18230_s26, %s16719_s10 }
  0x1f   : > { %v14807_v8 = vld [vmem:[%s16931_s5 + $0x60] sm:$0xff]  ;;  %v273_v19 = vsub.f32 %v16946_v12, %v16955_v16  ;;  %v17056_v46 = vand.u32 4294901760, %v722_v43  ;;  %s16819_s25 = smov [#allocation2]  }
  0x20   : > { %v14799_v10 = vld [vmem:[%s16931_s5 + $0x20] sm:$0xff]  ;;  %v1095_v11 = vsel %vm189_vm1, %v14807_v8, 0  ;;  %p16721_p1 = pnand %p16720_p0, %p16883_p3  ;;  %s16723_s2 = sshll.u32 %s16819_s25, 4  ;;  %s16724_s2 = int_to_ptr.vmem [resolvable:$false] %s16723_s2 }
  0x21   : > { %v191_v13 = vsel %vm189_vm1, %v14799_v10, 0  ;;  %v16950_v14 = vand.u32 4294901760, %v1095_v11  ;;  %v16961_v24 = vand.u32 4294901760, %v273_v19  ;;  %v14806_v27 = vld [vmem:[%s16931_s5 + $0x40] sm:$0xff]  ;;  %s16725_s3 = scalar_lea.vmem %s16724_s2, 2048  ;;  %p16726_p4 = scmp.lt.s32.totalorder %s18230_s26, %s16724_s2 }
  0x22   : > { %v16952_v15 = vand.u32 4294901760, %v191_v13  ;;  %v186_v28 = vld [vmem:[%s16931_s5] sm:$0xff]  ;;  %v1544_v29 = vsel %vm189_vm1, %v14806_v27, 0  ;;  %p16722_p2 = pneg %p16721_p1  ;;  %p16727_p5 = scmp.lt.s32.totalorder %s16725_s3, %s16719_s10 }
  0x23   : > { %v1164_v17 = vsub.f32 %v1095_v11, %v16950_v14  ;;  %v640_v30 = vsel %vm189_vm1, %v186_v28, 0  ;;  %v17012_v32 = vand.u32 4294901760, %v1544_v29  ;;  %v14824_v47 = vld [vmem:[%s16931_s5 + $0xe0] sm:$0xff] }
  0x24   : > { %v260_v18 = vsub.f32 %v191_v13, %v16952_v15  ;;  %v17014_v33 = vand.u32 4294901760, %v640_v30  ;;  %v14815_v48 = vld [vmem:[%s16931_s5 + $0xa0] sm:$0xff]  ;;  %v2907_v49 = vsel %vm189_vm1, %v14824_v47, 0  ;;  %p16728_p6 = por %p16727_p5, %p16726_p4 }
  0x25   : > { %v1165_v20 = vand.u32 4294901760, %v1164_v17  ;;  %v1613_v35 = vsub.f32 %v1544_v29, %v17012_v32  ;;  %v2003_v50 = vsel %vm189_vm1, %v14815_v48, 0  ;;  %v17092_v51 = vand.u32 4294901760, %v2907_v49  ;;  %v14823_v61 = vld [vmem:[%s16931_s5 + $0xc0] sm:$0xff] }
  0x26   : > { %v261_v21 = vand.u32 4294901760, %v260_v18  ;;  %v709_v36 = vsub.f32 %v640_v30, %v17014_v33  ;;  %v17094_v52 = vand.u32 4294901760, %v2003_v50  ;;  %v14814_v62 = vld [vmem:[%s16931_s5 + $0x80] sm:$0xff]  ;;  %v3356_v63 = vsel %vm189_vm1, %v14823_v61, 0  ;;  %p16729_p7 = pnand %p16728_p6, %p16722_p2 }
  0x27   : > { %v1166_v22 = vsub.f32 %v1164_v17, %v1165_v20  ;;  %v1614_v38 = vand.u32 4294901760, %v1613_v35  ;;  %v2976_v53 = vsub.f32 %v2907_v49, %v17092_v51  ;;  %v2452_v0 = vsel %vm189_vm1, %v14814_v62, 0  ;;  %v14860_v49 = vld [vmem:[%s16931_s5 + $0xe8] sm:$0xff] }
  0x28   : > { %v262_v23 = vsub.f32 %v260_v18, %v261_v21  ;;  %v710_v39 = vand.u32 4294901760, %v709_v36  ;;  %v2072_v54 = vsub.f32 %v2003_v50, %v17094_v52  ;;  %v17176_v2 = vand.u32 4294901760, %v3356_v63  ;;  %v14851_v50 = vld [vmem:[%s16931_s5 + $0xa8] sm:$0xff] }
  0x29   : > { %v1167_v25 = vand.u32 4294901760, %v1166_v22  ;;  %v1615_v41 = vsub.f32 %v1613_v35, %v1614_v38  ;;  %v2977_v55 = vand.u32 4294901760, %v2976_v53  ;;  %v17178_v3 = vand.u32 4294901760, %v2452_v0 }
  0x2a   : > { %v263_v26 = vand.u32 4294901760, %v262_v23  ;;  %v711_v42 = vsub.f32 %v709_v36, %v710_v39  ;;  %v2073_v56 = vand.u32 4294901760, %v2072_v54  ;;  %v3425_v4 = vsub.f32 %v3356_v63, %v17176_v2  ;;  %v14859_v63 = vld [vmem:[%s16931_s5 + $0xc8] sm:$0xff] }
  0x2b   : > { %15393 = vmatmul.mubr.f32.vlgmr.msra.gmra.mrb[0].mxu1 %v1167_v25  ;;  %v1616_v44 = vand.u32 4294901760, %v1615_v41  ;;  %v2978_v57 = vsub.f32 %v2976_v53, %v2977_v55  ;;  %v2521_v5 = vsub.f32 %v2452_v0, %v17178_v3 }
  0x2c   : > { %15333 = vmatmul.mubr.f32.vlgmr.msra.gmra.mrb[0].mxu0 %v263_v26  ;;  %15396 = vmatpush3.msra.mxu1 %v16961_v24  ;;  %v712_v45 = vand.u32 4294901760, %v711_v42  ;;  %v2074_v58 = vsub.f32 %v2072_v54, %v2073_v56  ;;  %v3426_v8 = vand.u32 4294901760, %v3425_v4 }
  0x2d   : > { %15397 = vmatprep.mubr.msk.f32.mxu1 %vm16816_vm0, %v16815_v1  ;;  %15400 = vmatprep.subr.mxu1 %v16815_v1  ;;  %v2979_v59 = vand.u32 4294901760, %v2978_v57  ;;  %v2522_v9 = vand.u32 4294901760, %v2521_v5 }
  0x2e   : > { %15336 = vmatpush3.msra.mxu0 %v16961_v24  ;;  %15337 = vmatprep.mubr.msk.f32.mxu0 %vm16816_vm0, %v16815_v1  ;;  %v2075_v60 = vand.u32 4294901760, %v2074_v58  ;;  %v3427_v10 = vsub.f32 %v3425_v4, %v3426_v8 }
  0x2f   : > { %15340 = vmatprep.subr.mxu0 %v16815_v1  ;;  %v2523_v11 = vsub.f32 %v2521_v5, %v2522_v9 }
  0x30   : > { %v3428_v13 = vand.u32 4294901760, %v3427_v10 }
  0x33   : > { %15398 = vmatmul.mubr.f32.vlgmr.msra.gmra.mrb[0].mxu1 %v16950_v14 }
  0x34   : > { %15338 = vmatmul.mubr.f32.vlgmr.msra.gmra.mrb[0].mxu0 %v16952_v15  ;;  %15401 = vmatpush3.msra.mxu1 %v16946_v12 }
  0x35   : > { %15402 = vmatprep.mubr.msk.f32.mxu1 %vm16816_vm0, %v16815_v1  ;;  %15405 = vmatprep.subr.mxu1 %v16815_v1 }
  0x36   : > { %15341 = vmatpush3.msra.mxu0 %v16946_v12  ;;  %15342 = vmatprep.mubr.msk.f32.mxu0 %vm16816_vm0, %v16815_v1 }
  0x37   : > { %15345 = vmatprep.subr.mxu0 %v16815_v1 }
  0x3b   : > { %15403 = vmatmul.mubr.f32.vlgmr.msra.gmra.mrb[0].mxu1 %v1164_v17  ;;  %v14833_v17 = vld [vmem:[%s16931_s5 + $0x28] sm:$0xff] }
  0x3c   : > { %15343 = vmatmul.mubr.f32.vlgmr.msra.gmra.mrb[0].mxu0 %v260_v18  ;;  %15406 = vmatpush3.msk.msra.mxu1 %vm16924_vm2, %v16817_v7  ;;  %v3814_v19 = vsel %vm189_vm1, %v14833_v17, 0 }
  0x3d   : > { %15407 = vmatprep.mubr.msk.f32.mxu1 %vm16816_vm0, %v16815_v1  ;;  %15410 = vmatprep.subr.mxu1 %v16815_v1 }
  0x3e   : > { %15346 = vmatpush3.msk.msra.mxu0 %vm16924_vm2, %v16817_v7  ;;  %15347 = vmatprep.mubr.msk.f32.mxu0 %vm16816_vm0, %v16815_v1 }
  0x3f   : > { %15350 = vmatprep.subr.mxu0 %v16815_v1 }
  0x43   : > { %15408 = vmatmul.mubr.f32.vlgmr.msra.gmra.mrb[0].mxu1 %v1165_v20 }
  0x44   : > { %15348 = vmatmul.mubr.f32.vlgmr.msra.gmra.mrb[0].mxu0 %v261_v21  ;;  %15411 = vmatpush3.msra.mxu1 %v16955_v16  ;;  %v17246_v21 = vand.u32 4294901760, %v3814_v19 }
  0x45   : > { %15412 = vmatprep.mubr.msk.f32.mxu1 %vm16816_vm0, %v16815_v1  ;;  %15415 = vmatprep.subr.mxu1 %v16815_v1 }
  0x46   : > { %15351 = vmatpush3.msra.mxu0 %v16955_v16  ;;  %15352 = vmatprep.mubr.msk.f32.mxu0 %vm16816_vm0, %v16815_v1  ;;  %v3883_v23 = vsub.f32 %v3814_v19, %v17246_v21 }
  0x47   : > { %15355 = vmatprep.subr.mxu0 %v16815_v1 }
  0x48   : > { %v3884_v26 = vand.u32 4294901760, %v3883_v23 }
  0x4a   : > { %v3885_v28 = vsub.f32 %v3883_v23, %v3884_v26 }
  0x4b   : > { %15413 = vmatmul.mubr.f32.vlgmr.msra.gmra.mrb[0].mxu1 %v16950_v14 }
  0x4c   : > { %15353 = vmatmul.mubr.f32.vlgmr.msra.gmra.mrb[0].mxu0 %v16952_v15  ;;  %15416 = vmatpush3.msk.msra.mxu1 %vm16924_vm2, %v16817_v7  ;;  %v3886_v30 = vand.u32 4294901760, %v3885_v28 }
  0x4d   : > { %15417 = vmatprep.mubr.msk.f32.mxu1 %vm16816_vm0, %v16815_v1  ;;  %15420 = vmatprep.subr.mxu1 %v16815_v1 }
  0x4e   : > { %15356 = vmatpush3.msk.msra.mxu0 %vm16924_vm2, %v16817_v7  ;;  %15357 = vmatprep.mubr.msk.f32.mxu0 %vm16816_vm0, %v16815_v1 }
  0x4f   : > { %15360 = vmatprep.subr.mxu0 %v16815_v1 }
  0x53   : > { %15418 = vmatmul.mubr.f32.vlgmr.msra.gmra.mrb[0].mxu1 %v16950_v14  ;;  %v2524_v14 = vand.u32 4294901760, %v2523_v11 }
  0x54   : > { %15358 = vmatmul.mubr.f32.vlgmr.msra.gmra.mrb[0].mxu0 %v16952_v15  ;;  %15421 = vmatpush3.msk.msra.mxu1 %vm17005_vm3, %v16817_v7  ;;  %v14842_v15 = vld [vmem:[%s16931_s5 + $0x68] sm:$0xff] }
  0x55   : > { %15422 = vmatprep.mubr.msk.f32.mxu1 %vm16816_vm0, %v16815_v1  ;;  %15425 = vmatprep.subr.mxu1 %v16815_v1  ;;  %v4718_v18 = vsel %vm189_vm1, %v14842_v15, 0 }
  0x56   : > { %15361 = vmatpush3.msk.msra.mxu0 %vm17005_vm3, %v16817_v7  ;;  %15362 = vmatprep.mubr.msk.f32.mxu0 %vm16816_vm0, %v16815_v1  ;;  %v17244_v20 = vand.u32 4294901760, %v4718_v18 }
  0x57   : > { %15365 = vmatprep.subr.mxu0 %v16815_v1 }
  0x58   : > { %v4787_v22 = vsub.f32 %v4718_v18, %v17244_v20 }
  0x5a   : > { %v4788_v25 = vand.u32 4294901760, %v4787_v22 }
  0x5b   : > { %15423 = vmatmul.mubr.f32.vlgmr.msra.gmra.mrb[0].mxu1 %v1616_v44 }
  0x5c   : > { %15363 = vmatmul.mubr.f32.vlgmr.msra.gmra.mrb[0].mxu0 %v712_v45  ;;  %15426 = vmatpush3.msra.mxu1 %v17056_v46  ;;  %v4789_v27 = vsub.f32 %v4787_v22, %v4788_v25 }
  0x5d   : > { %15427 = vmatprep.mubr.msk.f32.mxu1 %vm16816_vm0, %v16815_v1  ;;  %15430 = vmatprep.subr.mxu1 %v16815_v1 }
  0x5e   : > { %15366 = vmatpush3.msra.mxu0 %v17056_v46  ;;  %15367 = vmatprep.mubr.msk.f32.mxu0 %vm16816_vm0, %v16815_v1  ;;  %v4790_v29 = vand.u32 4294901760, %v4789_v27 }
  0x5f   : > { %15370 = vmatprep.subr.mxu0 %v16815_v1 }
  0x63   : > { %15428 = vmatmul.mubr.f32.vlgmr.msra.gmra.mrb[0].mxu1 %v17012_v32 }
  0x64   : > { %15368 = vmatmul.mubr.f32.vlgmr.msra.gmra.mrb[0].mxu0 %v17014_v33  ;;  %15431 = vmatpush3.msra.mxu1 %v17028_v37 }
  0x65   : > { %15432 = vmatprep.mubr.msk.f32.mxu1 %vm16816_vm0, %v16815_v1  ;;  %15435 = vmatprep.subr.mxu1 %v16815_v1 }
  0x66   : > { %15371 = vmatpush3.msra.mxu0 %v17028_v37  ;;  %15372 = vmatprep.mubr.msk.f32.mxu0 %vm16816_vm0, %v16815_v1 }
  0x67   : > { %15375 = vmatprep.subr.mxu0 %v16815_v1 }
  0x6b   : > { %15433 = vmatmul.mubr.f32.vlgmr.msra.gmra.mrb[0].mxu1 %v1613_v35 }
  0x6c   : > { %15373 = vmatmul.mubr.f32.vlgmr.msra.gmra.mrb[0].mxu0 %v709_v36  ;;  %15436 = vmatpush3.msk.msra.mxu1 %vm17005_vm3, %v16817_v7 }
  0x6d   : > { %15437 = vmatprep.mubr.msk.f32.mxu1 %vm16816_vm0, %v16815_v1  ;;  %15440 = vmatprep.subr.mxu1 %v16815_v1 }
  0x6e   : > { %15376 = vmatpush3.msk.msra.mxu0 %vm17005_vm3, %v16817_v7  ;;  %15377 = vmatprep.mubr.msk.f32.mxu0 %vm16816_vm0, %v16815_v1 }
  0x6f   : > { %15380 = vmatprep.subr.mxu0 %v16815_v1 }
  0x73   : > { %15438 = vmatmul.mubr.f32.vlgmr.msra.gmra.mrb[0].mxu1 %v1614_v38 }
  0x74   : > { %15378 = vmatmul.mubr.f32.vlgmr.msra.gmra.mrb[0].mxu0 %v710_v39  ;;  %15441 = vmatpush3.msra.mxu1 %v17038_v40 }
  0x75   : > { %15442 = vmatprep.mubr.msk.f32.mxu1 %vm16816_vm0, %v16815_v1  ;;  %15445 = vmatprep.subr.mxu1 %v16815_v1 }
  0x76   : > { %15381 = vmatpush3.msra.mxu0 %v17038_v40  ;;  %15382 = vmatprep.mubr.msk.f32.mxu0 %vm16816_vm0, %v16815_v1 }
  0x77   : > { %15385 = vmatprep.subr.mxu0 %v16815_v1 }
  0x7b   : > { %15443 = vmatmul.mubr.f32.vlgmr.msra.gmra.mrb[0].mxu1 %v17012_v32 }
  0x7c   : > { %15383 = vmatmul.mubr.f32.vlgmr.msra.gmra.mrb[0].mxu0 %v17014_v33  ;;  %15446 = vmatpush3.msk.msra.mxu1 %vm17005_vm3, %v16817_v7 }
  0x7d   : > { %15447 = vmatprep.mubr.msk.f32.mxu1 %vm16816_vm0, %v16815_v1  ;;  %15510 = vmatprep.subr.mxu1 %v16815_v1 }
  0x7e   : > { %15386 = vmatpush3.msk.msra.mxu0 %vm17005_vm3, %v16817_v7  ;;  %15387 = vmatprep.mubr.msk.f32.mxu0 %vm16816_vm0, %v16815_v1 }
  0x7f   : > { %15450 = vmatprep.subr.mxu0 %v16815_v1 }
  0x83   : > { %15448 = vmatmul.mubr.f32.vlgmr.msra.gmra.mrb[0].mxu1 %v17012_v32  ;;  %v14841_v32 = vld [vmem:[%s16931_s5 + $0x48] sm:$0xff] }
  0x84   : > { %15388 = vmatmul.mubr.f32.vlgmr.msra.gmra.mrb[0].mxu0 %v17014_v33  ;;  %15511 = vmatpush3.msk.msra.mxu1 %vm16924_vm2, %v16817_v7  ;;  %v14832_v33 = vld [vmem:[%s16931_s5 + $0x8] sm:$0xff]  ;;  %v5167_v34 = vsel %vm189_vm1, %v14841_v32, 0 }
  0x85   : > { %15512 = vmatprep.mubr.msk.f32.mxu1 %vm16816_vm0, %v16815_v1  ;;  %15515 = vmatprep.subr.mxu1 %v16815_v1  ;;  %v4263_v35 = vsel %vm189_vm1, %v14832_v33, 0  ;;  %v17328_v36 = vand.u32 4294901760, %v5167_v34 }
  0x86   : > { %15451 = vmatpush3.msk.msra.mxu0 %vm16924_vm2, %v16817_v7  ;;  %15452 = vmatprep.mubr.msk.f32.mxu0 %vm16816_vm0, %v16815_v1  ;;  %v17330_v38 = vand.u32 4294901760, %v4263_v35 }
  0x87   : > { %15455 = vmatprep.subr.mxu0 %v16815_v1  ;;  %15513 = vmatmul.mubr.f32.vlgmr.msra.gmra.mrb[2].mxu1 %v2979_v59  ;;  %v5236_v39 = vsub.f32 %v5167_v34, %v17328_v36 }
  0x88   : > { %15453 = vmatmul.mubr.f32.vlgmr.msra.gmra.mrb[2].mxu0 %v2075_v60  ;;  %15516 = vmatpush3.msra.mxu1 %v16961_v24  ;;  %v4332_v41 = vsub.f32 %v4263_v35, %v17330_v38 }
  0x89   : > { %15517 = vmatprep.mubr.msk.f32.mxu1 %vm16816_vm0, %v16815_v1  ;;  %15520 = vmatprep.subr.mxu1 %v16815_v1  ;;  %v5237_v42 = vand.u32 4294901760, %v5236_v39 }
  0x8a   : > { %15456 = vmatpush3.msra.mxu0 %v16961_v24  ;;  %15457 = vmatprep.mubr.msk.f32.mxu0 %vm16816_vm0, %v16815_v1  ;;  %v4333_v43 = vand.u32 4294901760, %v4332_v41 }
  0x8b   : > { %15460 = vmatprep.subr.mxu0 %v16815_v1  ;;  %v5238_v44 = vsub.f32 %v5236_v39, %v5237_v42 }
  0x8c   : > { %v4334_v45 = vsub.f32 %v4332_v41, %v4333_v43 }
  0x8d   : > { %v5239_v47 = vand.u32 4294901760, %v5238_v44 }
  0x8e   : > { %v4335_v48 = vand.u32 4294901760, %v4334_v45  ;;  %v14868_v45 = vld [vmem:[%s16931_s5 + $0x10] sm:$0xff] }
  0x8f   : > { %15518 = vmatmul.mubr.f32.vlgmr.msra.gmra.mrb[2].mxu1 %v17092_v51 }
  0x90   : > { %15458 = vmatmul.mubr.f32.vlgmr.msra.gmra.mrb[2].mxu0 %v17094_v52  ;;  %15521 = vmatpush3.msra.mxu1 %v16946_v12 }
  0x91   : > { %15522 = vmatprep.mubr.msk.f32.mxu1 %vm16816_vm0, %v16815_v1  ;;  %15525 = vmatprep.subr.mxu1 %v16815_v1 }
  0x92   : > { %15461 = vmatpush3.msra.mxu0 %v16946_v12  ;;  %15462 = vmatprep.mubr.msk.f32.mxu0 %vm16816_vm0, %v16815_v1 }
  0x93   : > { %15465 = vmatprep.subr.mxu0 %v16815_v1 }
  0x97   : > { %15523 = vmatmul.mubr.f32.vlgmr.msra.gmra.mrb[2].mxu1 %v2976_v53 }
  0x98   : > { %15463 = vmatmul.mubr.f32.vlgmr.msra.gmra.mrb[2].mxu0 %v2072_v54  ;;  %15526 = vmatpush3.msk.msra.mxu1 %vm16924_vm2, %v16817_v7 }
  0x99   : > { %15527 = vmatprep.mubr.msk.f32.mxu1 %vm16816_vm0, %v16815_v1  ;;  %15530 = vmatprep.subr.mxu1 %v16815_v1 }
  0x9a   : > { %15466 = vmatpush3.msk.msra.mxu0 %vm16924_vm2, %v16817_v7  ;;  %15467 = vmatprep.mubr.msk.f32.mxu0 %vm16816_vm0, %v16815_v1 }
  0x9b   : > { %15470 = vmatprep.subr.mxu0 %v16815_v1 }
  0x9f   : > { %15528 = vmatmul.mubr.f32.vlgmr.msra.gmra.mrb[2].mxu1 %v2977_v55 }
  0xa0   : > { %15468 = vmatmul.mubr.f32.vlgmr.msra.gmra.mrb[2].mxu0 %v2073_v56  ;;  %15531 = vmatpush3.msra.mxu1 %v16955_v16 }
  0xa1   : > { %15532 = vmatprep.mubr.msk.f32.mxu1 %vm16816_vm0, %v16815_v1  ;;  %15535 = vmatprep.subr.mxu1 %v16815_v1 }
  0xa2   : > { %15471 = vmatpush3.msra.mxu0 %v16955_v16  ;;  %15472 = vmatprep.mubr.msk.f32.mxu0 %vm16816_vm0, %v16815_v1 }
  0xa3   : > { %15475 = vmatprep.subr.mxu0 %v16815_v1 }
  0xa7   : > { %15533 = vmatmul.mubr.f32.vlgmr.msra.gmra.mrb[2].mxu1 %v17092_v51 }
  0xa8   : > { %15473 = vmatmul.mubr.f32.vlgmr.msra.gmra.mrb[2].mxu0 %v17094_v52  ;;  %15536 = vmatpush3.msk.msra.mxu1 %vm16924_vm2, %v16817_v7 }
  0xa9   : > { %15537 = vmatprep.mubr.msk.f32.mxu1 %vm16816_vm0, %v16815_v1  ;;  %15540 = vmatprep.subr.mxu1 %v16815_v1 }
  0xaa   : > { %15476 = vmatpush3.msk.msra.mxu0 %vm16924_vm2, %v16817_v7  ;;  %15477 = vmatprep.mubr.msk.f32.mxu0 %vm16816_vm0, %v16815_v1 }
  0xab   : > { %15480 = vmatprep.subr.mxu0 %v16815_v1 }
  0xaf   : > { %15538 = vmatmul.mubr.f32.vlgmr.msra.gmra.mrb[2].mxu1 %v17092_v51  ;;  %v6529_v51 = vsel %vm189_vm1, %v14860_v49, 0 }
  0xb0   : > { %15478 = vmatmul.mubr.f32.vlgmr.msra.gmra.mrb[2].mxu0 %v17094_v52  ;;  %15541 = vmatpush3.msk.msra.mxu1 %vm17005_vm3, %v16817_v7  ;;  %v5625_v52 = vsel %vm189_vm1, %v14851_v50, 0  ;;  %v17396_v53 = vand.u32 4294901760, %v6529_v51 }
  0xb1   : > { %15542 = vmatprep.mubr.msk.f32.mxu1 %vm16816_vm0, %v16815_v1  ;;  %15545 = vmatprep.subr.mxu1 %v16815_v1  ;;  %v17398_v54 = vand.u32 4294901760, %v5625_v52 }
  0xb2   : > { %15481 = vmatpush3.msk.msra.mxu0 %vm17005_vm3, %v16817_v7  ;;  %15482 = vmatprep.mubr.msk.f32.mxu0 %vm16816_vm0, %v16815_v1  ;;  %v6598_v55 = vsub.f32 %v6529_v51, %v17396_v53 }
  0xb3   : > { %15485 = vmatprep.subr.mxu0 %v16815_v1  ;;  %v17410_v56 = vsub.f32 %v5625_v52, %v17398_v54 }
  0xb4   : > { %v6599_v57 = vand.u32 4294901760, %v6598_v55 }
  0xb5   : > { %v5695_v58 = vand.u32 4294901760, %v17410_v56 }
  0xb6   : > { %v6600_v59 = vsub.f32 %v6598_v55, %v6599_v57 }
  0xb7   : > { %15543 = vmatmul.mubr.f32.vlgmr.msra.gmra.mrb[2].mxu1 %v3428_v13  ;;  %v5696_v60 = vsub.f32 %v17410_v56, %v5695_v58 }
  0xb8   : > { %15483 = vmatmul.mubr.f32.vlgmr.msra.gmra.mrb[2].mxu0 %v2524_v14  ;;  %15546 = vmatpush3.msra.mxu1 %v17056_v46  ;;  %v6601_v61 = vand.u32 4294901760, %v6600_v59 }
  0xb9   : > { %15547 = vmatprep.mubr.msk.f32.mxu1 %vm16816_vm0, %v16815_v1  ;;  %15550 = vmatprep.subr.mxu1 %v16815_v1  ;;  %v5697_v62 = vand.u32 4294901760, %v5696_v60  ;;  %v14896_v60 = vld [vmem:[%s16931_s5 + $0xf0] sm:$0xff] }
  0xba   : > { %15486 = vmatpush3.msra.mxu0 %v17056_v46  ;;  %15487 = vmatprep.mubr.msk.f32.mxu0 %vm16816_vm0, %v16815_v1 }
  0xbb   : > { %15490 = vmatprep.subr.mxu0 %v16815_v1 }
  0xbf   : > { %15548 = vmatmul.mubr.f32.vlgmr.msra.gmra.mrb[2].mxu1 %v17176_v2 }
  0xc0   : > { %15488 = vmatmul.mubr.f32.vlgmr.msra.gmra.mrb[2].mxu0 %v17178_v3  ;;  %15551 = vmatpush3.msra.mxu1 %v17028_v37 }
  0xc1   : > { %15552 = vmatprep.mubr.msk.f32.mxu1 %vm16816_vm0, %v16815_v1  ;;  %15555 = vmatprep.subr.mxu1 %v16815_v1 }
  0xc2   : > { %15491 = vmatpush3.msra.mxu0 %v17028_v37  ;;  %15492 = vmatprep.mubr.msk.f32.mxu0 %vm16816_vm0, %v16815_v1 }
  0xc3   : > { %15495 = vmatprep.subr.mxu0 %v16815_v1 }
  0xc7   : > { %15553 = vmatmul.mubr.f32.vlgmr.msra.gmra.mrb[2].mxu1 %v3425_v4 }
  0xc8   : > { %15493 = vmatmul.mubr.f32.vlgmr.msra.gmra.mrb[2].mxu0 %v2521_v5  ;;  %15556 = vmatpush3.msk.msra.mxu1 %vm17005_vm3, %v16817_v7  ;;  %v14850_v5 = vld [vmem:[%s16931_s5 + $0x88] sm:$0xff] }
  0xc9   : > { %15557 = vmatprep.mubr.msk.f32.mxu1 %vm16816_vm0, %v16815_v1  ;;  %15560 = vmatprep.subr.mxu1 %v16815_v1 }
  0xca   : > { %15496 = vmatpush3.msk.msra.mxu0 %vm17005_vm3, %v16817_v7  ;;  %15497 = vmatprep.mubr.msk.f32.mxu0 %vm16816_vm0, %v16815_v1 }
  0xcb   : > { %15500 = vmatprep.subr.mxu0 %v16815_v1 }
  0xcf   : > { %15558 = vmatmul.mubr.f32.vlgmr.msra.gmra.mrb[2].mxu1 %v3426_v8  ;;  %v6978_v8 = vsel %vm189_vm1, %v14859_v63, 0 }
  0xd0   : > { %15498 = vmatmul.mubr.f32.vlgmr.msra.gmra.mrb[2].mxu0 %v2522_v9  ;;  %15561 = vmatpush3.msra.mxu1 %v17038_v40  ;;  %v6074_v9 = vsel %vm189_vm1, %v14850_v5, 0  ;;  %v17492_v10 = vand.u32 4294901760, %v6978_v8 }
  0xd1   : > { %15562 = vmatprep.mubr.msk.f32.mxu1 %vm16816_vm0, %v16815_v1  ;;  %15565 = vmatprep.subr.mxu1 %v16815_v1  ;;  %v17495_v11 = vand.u32 4294901760, %v6074_v9 }
  0xd2   : > { %15501 = vmatpush3.msra.mxu0 %v17038_v40  ;;  %15502 = vmatprep.mubr.msk.f32.mxu0 %vm16816_vm0, %v16815_v1  ;;  %v7047_v13 = vsub.f32 %v6978_v8, %v17492_v10 }
  0xd3   : > { %15505 = vmatprep.subr.mxu0 %v16815_v1  ;;  %v6143_v14 = vsub.f32 %v6074_v9, %v17495_v11 }
  0xd4   : > { %v7048_v15 = vand.u32 4294901760, %v7047_v13 }
  0xd5   : > { %v6144_v17 = vand.u32 4294901760, %v6143_v14 }
  0xd6   : > { %v7049_v18 = vsub.f32 %v7047_v13, %v7048_v15 }
  0xd7   : > { %15563 = vmatmul.mubr.f32.vlgmr.msra.gmra.mrb[2].mxu1 %v17176_v2  ;;  %v6145_v19 = vsub.f32 %v6143_v14, %v6144_v17 }
  0xd8   : > { %15503 = vmatmul.mubr.f32.vlgmr.msra.gmra.mrb[2].mxu0 %v17178_v3  ;;  %15566 = vmatpush3.msk.msra.mxu1 %vm17005_vm3, %v16817_v7 }
  0xd9   : > { %15567 = vmatprep.mubr.msk.f32.mxu1 %vm16816_vm0, %v16815_v1  ;;  %15630 = vmatprep.subr.mxu1 %v16815_v1 }
  0xda   : > { %15506 = vmatpush3.msk.msra.mxu0 %vm17005_vm3, %v16817_v7  ;;  %15507 = vmatprep.mubr.msk.f32.mxu0 %vm16816_vm0, %v16815_v1 }
  0xdb   : > { %15570 = vmatprep.subr.mxu0 %v16815_v1 }
  0xdf   : > { %15568 = vmatmul.mubr.f32.vlgmr.msra.gmra.mrb[2].mxu1 %v17176_v2 }
  0xe0   : > { %15508 = vmatmul.mubr.f32.vlgmr.msra.gmra.mrb[2].mxu0 %v17178_v3  ;;  %15631 = vmatpush3.msk.msra.mxu1 %vm16924_vm2, %v16817_v7 }
  0xe1   : > { %15632 = vmatprep.mubr.msk.f32.mxu1 %vm16816_vm0, %v16815_v1  ;;  %15635 = vmatprep.subr.mxu1 %v16815_v1 }
  0xe2   : > { %15571 = vmatpush3.msk.msra.mxu0 %vm16924_vm2, %v16817_v7  ;;  %15572 = vmatprep.mubr.msk.f32.mxu0 %vm16816_vm0, %v16815_v1 }
  0xe3   : > { %15575 = vmatprep.subr.mxu0 %v16815_v1  ;;  %15633 = vmatmul.mubr.f32.vlgmr.msra.gmra.mrb[4].mxu1 %v4790_v29 }
  0xe4   : > { %15573 = vmatmul.mubr.f32.vlgmr.msra.gmra.mrb[4].mxu0 %v3886_v30  ;;  %15636 = vmatpush3.msra.mxu1 %v16961_v24 }
  0xe5   : > { %15637 = vmatprep.mubr.msk.f32.mxu1 %vm16816_vm0, %v16815_v1  ;;  %15640 = vmatprep.subr.mxu1 %v16815_v1 }
  0xe6   : > { %15576 = vmatpush3.msra.mxu0 %v16961_v24  ;;  %15577 = vmatprep.mubr.msk.f32.mxu0 %vm16816_vm0, %v16815_v1 }
  0xe7   : > { %15580 = vmatprep.subr.mxu0 %v16815_v1 }
  0xeb   : > { %15638 = vmatmul.mubr.f32.vlgmr.msra.gmra.mrb[4].mxu1 %v17244_v20 }
  0xec   : > { %15578 = vmatmul.mubr.f32.vlgmr.msra.gmra.mrb[4].mxu0 %v17246_v21  ;;  %15641 = vmatpush3.msra.mxu1 %v16946_v12 }
  0xed   : > { %15642 = vmatprep.mubr.msk.f32.mxu1 %vm16816_vm0, %v16815_v1  ;;  %15645 = vmatprep.subr.mxu1 %v16815_v1 }
  0xee   : > { %15581 = vmatpush3.msra.mxu0 %v16946_v12  ;;  %15582 = vmatprep.mubr.msk.f32.mxu0 %vm16816_vm0, %v16815_v1 }
  0xef   : > { %15585 = vmatprep.subr.mxu0 %v16815_v1 }
  0xf3   : > { %15643 = vmatmul.mubr.f32.vlgmr.msra.gmra.mrb[4].mxu1 %v4787_v22  ;;  %v14878_v22 = vld [vmem:[%s16931_s5 + $0x70] sm:$0xff] }
  0xf4   : > { %15583 = vmatmul.mubr.f32.vlgmr.msra.gmra.mrb[4].mxu0 %v3883_v23  ;;  %15646 = vmatpush3.msk.msra.mxu1 %vm16924_vm2, %v16817_v7  ;;  %v14869_v23 = vld [vmem:[%s16931_s5 + $0x30] sm:$0xff] }
  0xf5   : > { %15647 = vmatprep.mubr.msk.f32.mxu1 %vm16816_vm0, %v16815_v1  ;;  %15650 = vmatprep.subr.mxu1 %v16815_v1 }
  0xf6   : > { %15586 = vmatpush3.msk.msra.mxu0 %vm16924_vm2, %v16817_v7  ;;  %15587 = vmatprep.mubr.msk.f32.mxu0 %vm16816_vm0, %v16815_v1 }
  0xf7   : > { %15590 = vmatprep.subr.mxu0 %v16815_v1 }
  0xfb   : > { %15648 = vmatmul.mubr.f32.vlgmr.msra.gmra.mrb[4].mxu1 %v4788_v25  ;;  %v8340_v25 = vsel %vm189_vm1, %v14878_v22, 0 }
  0xfc   : > { %15588 = vmatmul.mubr.f32.vlgmr.msra.gmra.mrb[4].mxu0 %v3884_v26  ;;  %15651 = vmatpush3.msra.mxu1 %v16955_v16  ;;  %v7436_v26 = vsel %vm189_vm1, %v14869_v23, 0  ;;  %v17561_v27 = vand.u32 4294901760, %v8340_v25 }
  0xfd   : > { %15652 = vmatprep.mubr.msk.f32.mxu1 %vm16816_vm0, %v16815_v1  ;;  %15655 = vmatprep.subr.mxu1 %v16815_v1  ;;  %v17567_v28 = vand.u32 4294901760, %v7436_v26 }
  0xfe   : > { %15591 = vmatpush3.msra.mxu0 %v16955_v16  ;;  %15592 = vmatprep.mubr.msk.f32.mxu0 %vm16816_vm0, %v16815_v1  ;;  %v8409_v29 = vsub.f32 %v8340_v25, %v17561_v27 }
  0xff   : > { %15595 = vmatprep.subr.mxu0 %v16815_v1  ;;  %v7505_v30 = vsub.f32 %v7436_v26, %v17567_v28 }
 0x100   : > { %v8410_v32 = vand.u32 4294901760, %v8409_v29 }
 0x101   : > { %v7506_v33 = vand.u32 4294901760, %v7505_v30 }
 0x102   : > { %v8411_v34 = vsub.f32 %v8409_v29, %v8410_v32 }
 0x103   : > { %15653 = vmatmul.mubr.f32.vlgmr.msra.gmra.mrb[4].mxu1 %v17244_v20  ;;  %v7507_v35 = vsub.f32 %v7505_v30, %v7506_v33 }
 0x104   : > { %15593 = vmatmul.mubr.f32.vlgmr.msra.gmra.mrb[4].mxu0 %v17246_v21  ;;  %15656 = vmatpush3.msk.msra.mxu1 %vm16924_vm2, %v16817_v7 }
 0x105   : > { %15657 = vmatprep.mubr.msk.f32.mxu1 %vm16816_vm0, %v16815_v1  ;;  %15660 = vmatprep.subr.mxu1 %v16815_v1 }
 0x106   : > { %15596 = vmatpush3.msk.msra.mxu0 %vm16924_vm2, %v16817_v7  ;;  %15597 = vmatprep.mubr.msk.f32.mxu0 %vm16816_vm0, %v16815_v1 }
 0x107   : > { %15600 = vmatprep.subr.mxu0 %v16815_v1 }
 0x10b   : > { %15658 = vmatmul.mubr.f32.vlgmr.msra.gmra.mrb[4].mxu1 %v17244_v20  ;;  %v7050_v20 = vand.u32 4294901760, %v7049_v18 }
 0x10c   : > { %15598 = vmatmul.mubr.f32.vlgmr.msra.gmra.mrb[4].mxu0 %v17246_v21  ;;  %15661 = vmatpush3.msk.msra.mxu1 %vm17005_vm3, %v16817_v7  ;;  %v6146_v21 = vand.u32 4294901760, %v6145_v19 }
 0x10d   : > { %15662 = vmatprep.mubr.msk.f32.mxu1 %vm16816_vm0, %v16815_v1  ;;  %15665 = vmatprep.subr.mxu1 %v16815_v1 }
 0x10e   : > { %15601 = vmatpush3.msk.msra.mxu0 %vm17005_vm3, %v16817_v7  ;;  %15602 = vmatprep.mubr.msk.f32.mxu0 %vm16816_vm0, %v16815_v1 }
 0x10f   : > { %15605 = vmatprep.subr.mxu0 %v16815_v1 }
 0x113   : > { %15663 = vmatmul.mubr.f32.vlgmr.msra.gmra.mrb[4].mxu1 %v5239_v47 }
 0x114   : > { %15603 = vmatmul.mubr.f32.vlgmr.msra.gmra.mrb[4].mxu0 %v4335_v48  ;;  %15666 = vmatpush3.msra.mxu1 %v17056_v46  ;;  %v7885_v48 = vsel %vm189_vm1, %v14868_v45, 0 }
 0x115   : > { %15667 = vmatprep.mubr.msk.f32.mxu1 %vm16816_vm0, %v16815_v1  ;;  %15670 = vmatprep.subr.mxu1 %v16815_v1  ;;  %v17650_v50 = vand.u32 4294901760, %v7885_v48 }
 0x116   : > { %15606 = vmatpush3.msra.mxu0 %v17056_v46  ;;  %15607 = vmatprep.mubr.msk.f32.mxu0 %vm16816_vm0, %v16815_v1 }
 0x117   : > { %15610 = vmatprep.subr.mxu0 %v16815_v1  ;;  %v7954_v52 = vsub.f32 %v7885_v48, %v17650_v50 }
 0x11b   : > { %15668 = vmatmul.mubr.f32.vlgmr.msra.gmra.mrb[4].mxu1 %v17328_v36 }
 0x11c   : > { %15608 = vmatmul.mubr.f32.vlgmr.msra.gmra.mrb[4].mxu0 %v17330_v38  ;;  %15671 = vmatpush3.msra.mxu1 %v17028_v37 }
 0x11d   : > { %15672 = vmatprep.mubr.msk.f32.mxu1 %vm16816_vm0, %v16815_v1  ;;  %15675 = vmatprep.subr.mxu1 %v16815_v1 }
 0x11e   : > { %15611 = vmatpush3.msra.mxu0 %v17028_v37  ;;  %15612 = vmatprep.mubr.msk.f32.mxu0 %vm16816_vm0, %v16815_v1 }
 0x11f   : > { %15615 = vmatprep.subr.mxu0 %v16815_v1 }
 0x123   : > { %15673 = vmatmul.mubr.f32.vlgmr.msra.gmra.mrb[4].mxu1 %v5236_v39  ;;  %v14877_v39 = vld [vmem:[%s16931_s5 + $0x50] sm:$0xff] }
 0x124   : > { %15613 = vmatmul.mubr.f32.vlgmr.msra.gmra.mrb[4].mxu0 %v4332_v41  ;;  %15676 = vmatpush3.msk.msra.mxu1 %vm17005_vm3, %v16817_v7  ;;  %v8789_v47 = vsel %vm189_vm1, %v14877_v39, 0 }
 0x125   : > { %15677 = vmatprep.mubr.msk.f32.mxu1 %vm16816_vm0, %v16815_v1  ;;  %15680 = vmatprep.subr.mxu1 %v16815_v1  ;;  %v17647_v49 = vand.u32 4294901760, %v8789_v47 }
 0x126   : > { %15616 = vmatpush3.msk.msra.mxu0 %vm17005_vm3, %v16817_v7  ;;  %15617 = vmatprep.mubr.msk.f32.mxu0 %vm16816_vm0, %v16815_v1 }
 0x127   : > { %15620 = vmatprep.subr.mxu0 %v16815_v1  ;;  %v8858_v51 = vsub.f32 %v8789_v47, %v17647_v49 }
 0x12b   : > { %15678 = vmatmul.mubr.f32.vlgmr.msra.gmra.mrb[4].mxu1 %v5237_v42 }
 0x12c   : > { %15618 = vmatmul.mubr.f32.vlgmr.msra.gmra.mrb[4].mxu0 %v4333_v43  ;;  %15681 = vmatpush3.msra.mxu1 %v17038_v40 }
 0x12d   : > { %15682 = vmatprep.mubr.msk.f32.mxu1 %vm16816_vm0, %v16815_v1  ;;  %15685 = vmatprep.subr.mxu1 %v16815_v1 }
 0x12e   : > { %15621 = vmatpush3.msra.mxu0 %v17038_v40  ;;  %15622 = vmatprep.mubr.msk.f32.mxu0 %vm16816_vm0, %v16815_v1 }
 0x12f   : > { %15625 = vmatprep.subr.mxu0 %v16815_v1 }
 0x133   : > { %15683 = vmatmul.mubr.f32.vlgmr.msra.gmra.mrb[4].mxu1 %v17328_v36 }
 0x134   : > { %15623 = vmatmul.mubr.f32.vlgmr.msra.gmra.mrb[4].mxu0 %v17330_v38  ;;  %15686 = vmatpush3.msk.msra.mxu1 %vm17005_vm3, %v16817_v7 }
 0x135   : > { %15687 = vmatprep.mubr.msk.f32.mxu1 %vm16816_vm0, %v16815_v1  ;;  %15750 = vmatprep.subr.mxu1 %v16815_v1 }
 0x136   : > { %15626 = vmatpush3.msk.msra.mxu0 %vm17005_vm3, %v16817_v7  ;;  %15627 = vmatprep.mubr.msk.f32.mxu0 %vm16816_vm0, %v16815_v1 }
 0x137   : > { %15690 = vmatprep.subr.mxu0 %v16815_v1 }
 0x13b   : > { %15688 = vmatmul.mubr.f32.vlgmr.msra.gmra.mrb[4].mxu1 %v17328_v36  ;;  %v8412_v36 = vand.u32 4294901760, %v8411_v34 }
 0x13c   : > { %15628 = vmatmul.mubr.f32.vlgmr.msra.gmra.mrb[4].mxu0 %v17330_v38  ;;  %15751 = vmatpush3.msk.msra.mxu1 %vm16924_vm2, %v16817_v7  ;;  %v7508_v38 = vand.u32 4294901760, %v7507_v35 }
 0x13d   : > { %15752 = vmatprep.mubr.msk.f32.mxu1 %vm16816_vm0, %v16815_v1  ;;  %15755 = vmatprep.subr.mxu1 %v16815_v1 }
 0x13e   : > { %15691 = vmatpush3.msk.msra.mxu0 %vm16924_vm2, %v16817_v7  ;;  %15692 = vmatprep.mubr.msk.f32.mxu0 %vm16816_vm0, %v16815_v1 }
 0x13f   : > { %15695 = vmatprep.subr.mxu0 %v16815_v1  ;;  %15753 = vmatmul.mubr.f32.vlgmr.msra.gmra.mrb[6].mxu1 %v6601_v61  ;;  %v14887_v61 = vld [vmem:[%s16931_s5 + $0xb0] sm:$0xff] }
 0x140   : > { %15693 = vmatmul.mubr.f32.vlgmr.msra.gmra.mrb[6].mxu0 %v5697_v62  ;;  %15756 = vmatpush3.msra.mxu1 %v16961_v24  ;;  %v10151_v62 = vsel %vm189_vm1, %v14896_v60, 0  ;;  %v9247_v63 = vsel %vm189_vm1, %v14887_v61, 0 }
 0x141   : > { %15757 = vmatprep.mubr.msk.f32.mxu1 %vm16816_vm0, %v16815_v1  ;;  %15760 = vmatprep.subr.mxu1 %v16815_v1 }
 0x142   : > { %15696 = vmatpush3.msra.mxu0 %v16961_v24  ;;  %15697 = vmatprep.mubr.msk.f32.mxu0 %vm16816_vm0, %v16815_v1 }
 0x143   : > { %15700 = vmatprep.subr.mxu0 %v16815_v1 }
 0x147   : > { %15758 = vmatmul.mubr.f32.vlgmr.msra.gmra.mrb[6].mxu1 %v17396_v53 }
 0x148   : > { %15698 = vmatmul.mubr.f32.vlgmr.msra.gmra.mrb[6].mxu0 %v17398_v54  ;;  %15761 = vmatpush3.msra.mxu1 %v16946_v12 }
 0x149   : > { %15762 = vmatprep.mubr.msk.f32.mxu1 %vm16816_vm0, %v16815_v1  ;;  %15765 = vmatprep.subr.mxu1 %v16815_v1 }
 0x14a   : > { %15701 = vmatpush3.msra.mxu0 %v16946_v12  ;;  %15702 = vmatprep.mubr.msk.f32.mxu0 %vm16816_vm0, %v16815_v1 }
 0x14b   : > { %15705 = vmatprep.subr.mxu0 %v16815_v1 }
 0x14f   : > { %15763 = vmatmul.mubr.f32.vlgmr.msra.gmra.mrb[6].mxu1 %v6598_v55 }
 0x150   : > { %15703 = vmatmul.mubr.f32.vlgmr.msra.gmra.mrb[6].mxu0 %v17410_v56  ;;  %15766 = vmatpush3.msk.msra.mxu1 %vm16924_vm2, %v16817_v7 }
 0x151   : > { %15767 = vmatprep.mubr.msk.f32.mxu1 %vm16816_vm0, %v16815_v1  ;;  %15770 = vmatprep.subr.mxu1 %v16815_v1 }
 0x152   : > { %15706 = vmatpush3.msk.msra.mxu0 %vm16924_vm2, %v16817_v7  ;;  %15707 = vmatprep.mubr.msk.f32.mxu0 %vm16816_vm0, %v16815_v1 }
 0x153   : > { %15710 = vmatprep.subr.mxu0 %v16815_v1 }
 0x156   : > { %v1988_v0 = vpop.f32.mrb[0].mxu1 }
 0x157   : > { %v1084_v2 = vpop.f32.mrb[0].mxu0  ;;  %15768 = vmatmul.mubr.f32.vlgmr.msra.gmra.mrb[6].mxu1 %v6599_v57  ;;  %1993 = vrot.lane.b32.xlu0 %v1988_v0, %s16818_s15  ;;  %v15449_v3 = vpop.f32.mrb[1].mxu1  ;;  %v17718_v0 = vand.u32 4294901760, %v10151_v62 }
 0x158   : > { %1089 = vst.msk [vmem:[%s17478_s18] sm:$0xff] %vm1088_vm4, %v1084_v2  ;;  %v15389_v4 = vpop.f32.mrb[1].mxu0  ;;  %15771 = vmatpush3.msra.mxu1 %v16955_v16  ;;  %15772 = vmatprep.mubr.msk.f32.mxu1 %vm16816_vm0, %v16815_v1  ;;  %v17724_v2 = vand.u32 4294901760, %v9247_v63 }
 0x159   : > { %15775 = vmatprep.subr.mxu1 %v16815_v1  ;;  %15708 = vmatmul.mubr.f32.vlgmr.msra.gmra.mrb[6].mxu0 %v5695_v58  ;;  %v10220_v3 = vsub.f32 %v10151_v62, %v17718_v0 }
 0x15a   : > { %15711 = vmatpush3.msra.mxu0 %v16955_v16  ;;  %15712 = vmatprep.mubr.msk.f32.mxu0 %vm16816_vm0, %v16815_v1  ;;  %v9316_v4 = vsub.f32 %v9247_v63, %v17724_v2 }
 0x15b   : > { %15715 = vmatprep.subr.mxu0 %v16815_v1  ;;  %v10221_v5 = vand.u32 4294901760, %v10220_v3 }
 0x15c   : > { %v9317_v8 = vand.u32 4294901760, %v9316_v4 }
 0x15d   : > { %v10222_v9 = vsub.f32 %v10220_v3, %v10221_v5 }
 0x15f   : > { %15773 = vmatmul.mubr.f32.vlgmr.msra.gmra.mrb[6].mxu1 %v17396_v53 }
 0x160   : > { %15776 = vmatpush3.msk.msra.mxu1 %vm16924_vm2, %v16817_v7  ;;  %15777 = vmatprep.mubr.msk.f32.mxu1 %vm16816_vm0, %v16815_v1 }
 0x161   : > { %15780 = vmatprep.subr.mxu1 %v16815_v1  ;;  %15713 = vmatmul.mubr.f32.vlgmr.msra.gmra.mrb[6].mxu0 %v17398_v54 }
 0x162   : > { %15716 = vmatpush3.msk.msra.mxu0 %vm16924_vm2, %v16817_v7  ;;  %15717 = vmatprep.mubr.msk.f32.mxu0 %vm16816_vm0, %v16815_v1 }
 0x163   : > { %15720 = vmatprep.subr.mxu0 %v16815_v1 }
 0x167   : > { %15778 = vmatmul.mubr.f32.vlgmr.msra.gmra.mrb[6].mxu1 %v17396_v53  ;;  %v8859_v53 = vand.u32 4294901760, %v8858_v51 }
 0x168   : > { %15781 = vmatpush3.msk.msra.mxu1 %vm17005_vm3, %v16817_v7  ;;  %15782 = vmatprep.mubr.msk.f32.mxu1 %vm16816_vm0, %v16815_v1 }
 0x169   : > { %15785 = vmatprep.subr.mxu1 %v16815_v1  ;;  %15718 = vmatmul.mubr.f32.vlgmr.msra.gmra.mrb[6].mxu0 %v17398_v54  ;;  %v7955_v54 = vand.u32 4294901760, %v7954_v52  ;;  %v8860_v55 = vsub.f32 %v8858_v51, %v8859_v53 }
 0x16a   : > { %15721 = vmatpush3.msk.msra.mxu0 %vm17005_vm3, %v16817_v7  ;;  %15722 = vmatprep.mubr.msk.f32.mxu0 %vm16816_vm0, %v16815_v1 }
 0x16b   : > { %15725 = vmatprep.subr.mxu0 %v16815_v1  ;;  %v7956_v56 = vsub.f32 %v7954_v52, %v7955_v54  ;;  %v8861_v57 = vand.u32 4294901760, %v8860_v55 }
 0x16d   : > { %v7957_v59 = vand.u32 4294901760, %v7956_v56  ;;  %v14904_v56 = vld [vmem:[%s16931_s5 + $0x18] sm:$0xff] }
 0x16e   : > { %v11507_v60 = vsel %vm189_vm1, %v14904_v56, 0 }
 0x16f   : > { %15783 = vmatmul.mubr.f32.vlgmr.msra.gmra.mrb[6].mxu1 %v7050_v20  ;;  %v14886_v20 = vld [vmem:[%s16931_s5 + $0x90] sm:$0xff]  ;;  %v17964_v62 = vand.u32 4294901760, %v11507_v60 }
 0x170   : > { %15786 = vmatpush3.msra.mxu1 %v17056_v46  ;;  %15787 = vmatprep.mubr.msk.f32.mxu1 %vm16816_vm0, %v16815_v1  ;;  %v9696_v22 = vsel %vm189_vm1, %v14886_v20, 0 }
 0x171   : > { %15790 = vmatprep.subr.mxu1 %v16815_v1  ;;  %15723 = vmatmul.mubr.f32.vlgmr.msra.gmra.mrb[6].mxu0 %v6146_v21  ;;  %v17807_v25 = vand.u32 4294901760, %v9696_v22 }
 0x172   : > { %15726 = vmatpush3.msra.mxu0 %v17056_v46  ;;  %15727 = vmatprep.mubr.msk.f32.mxu0 %vm16816_vm0, %v16815_v1 }
 0x173   : > { %15730 = vmatprep.subr.mxu0 %v16815_v1 }
 0x177   : > { %15788 = vmatmul.mubr.f32.vlgmr.msra.gmra.mrb[6].mxu1 %v17492_v10 }
 0x178   : > { %15791 = vmatpush3.msra.mxu1 %v17028_v37  ;;  %15792 = vmatprep.mubr.msk.f32.mxu1 %vm16816_vm0, %v16815_v1 }
 0x179   : > { %15795 = vmatprep.subr.mxu1 %v16815_v1  ;;  %15728 = vmatmul.mubr.f32.vlgmr.msra.gmra.mrb[6].mxu0 %v17495_v11 }
 0x17a   : > { %15731 = vmatpush3.msra.mxu0 %v17028_v37  ;;  %15732 = vmatprep.mubr.msk.f32.mxu0 %vm16816_vm0, %v16815_v1 }
 0x17b   : > { %15735 = vmatprep.subr.mxu0 %v16815_v1 }
 0x17f   : > { %15793 = vmatmul.mubr.f32.vlgmr.msra.gmra.mrb[6].mxu1 %v7047_v13 }
 0x180   : > { %15796 = vmatpush3.msk.msra.mxu1 %vm17005_vm3, %v16817_v7  ;;  %15797 = vmatprep.mubr.msk.f32.mxu1 %vm16816_vm0, %v16815_v1 }
 0x181   : > { %15800 = vmatprep.subr.mxu1 %v16815_v1  ;;  %15733 = vmatmul.mubr.f32.vlgmr.msra.gmra.mrb[6].mxu0 %v6143_v14  ;;  %v14895_v14 = vld [vmem:[%s16931_s5 + $0xd0] sm:$0xff] }
 0x182   : > { %15736 = vmatpush3.msk.msra.mxu0 %vm17005_vm3, %v16817_v7  ;;  %15737 = vmatprep.mubr.msk.f32.mxu0 %vm16816_vm0, %v16815_v1  ;;  %v10600_v21 = vsel %vm189_vm1, %v14895_v14, 0 }
 0x183   : > { %15740 = vmatprep.subr.mxu0 %v16815_v1  ;;  %v17804_v23 = vand.u32 4294901760, %v10600_v21 }
 0x185   : > { %v10669_v26 = vsub.f32 %v10600_v21, %v17804_v23 }
 0x187   : > { %15798 = vmatmul.mubr.f32.vlgmr.msra.gmra.mrb[6].mxu1 %v7048_v15 }
 0x188   : > { %15801 = vmatpush3.msra.mxu1 %v17038_v40  ;;  %15802 = vmatprep.mubr.msk.f32.mxu1 %vm16816_vm0, %v16815_v1 }
 0x189   : > { %15805 = vmatprep.subr.mxu1 %v16815_v1  ;;  %15738 = vmatmul.mubr.f32.vlgmr.msra.gmra.mrb[6].mxu0 %v6144_v17 }
 0x18a   : > { %15741 = vmatpush3.msra.mxu0 %v17038_v40  ;;  %15742 = vmatprep.mubr.msk.f32.mxu0 %vm16816_vm0, %v16815_v1 }
 0x18b   : > { %15745 = vmatprep.subr.mxu0 %v16815_v1 }
 0x18f   : > { %15803 = vmatmul.mubr.f32.vlgmr.msra.gmra.mrb[6].mxu1 %v17492_v10 }
 0x190   : > { %15806 = vmatpush3.msk.msra.mxu1 %vm17005_vm3, %v16817_v7  ;;  %15807 = vmatprep.mubr.msk.f32.mxu1 %vm16816_vm0, %v16815_v1 }
 0x191   : > { %15870 = vmatprep.subr.mxu1 %v16815_v1  ;;  %15743 = vmatmul.mubr.f32.vlgmr.msra.gmra.mrb[6].mxu0 %v17495_v11 }
 0x192   : > { %15746 = vmatpush3.msk.msra.mxu0 %vm17005_vm3, %v16817_v7  ;;  %15747 = vmatprep.mubr.msk.f32.mxu0 %vm16816_vm0, %v16815_v1 }
 0x193   : > { %15810 = vmatprep.subr.mxu0 %v16815_v1 }
 0x197   : > { %15808 = vmatmul.mubr.f32.vlgmr.msra.gmra.mrb[6].mxu1 %v17492_v10  ;;  %v9318_v10 = vsub.f32 %v9316_v4, %v9317_v8 }
 0x198   : > { %15871 = vmatpush3.msk.msra.mxu1 %vm16924_vm2, %v16817_v7  ;;  %15872 = vmatprep.mubr.msk.f32.mxu1 %vm16816_vm0, %v16815_v1 }
 0x199   : > { %15875 = vmatprep.subr.mxu1 %v16815_v1  ;;  %15748 = vmatmul.mubr.f32.vlgmr.msra.gmra.mrb[6].mxu0 %v17495_v11  ;;  %v10223_v11 = vand.u32 4294901760, %v10222_v9  ;;  %v9319_v13 = vand.u32 4294901760, %v9318_v10 }
 0x19a   : > { %15811 = vmatpush3.msk.msra.mxu0 %vm16924_vm2, %v16817_v7  ;;  %15812 = vmatprep.mubr.msk.f32.mxu0 %vm16816_vm0, %v16815_v1 }
 0x19b   : > { %15873 = vmatmul.mubr.f32.vlgmr.msra.gmra.mrb[8].mxu1 %v8412_v36  ;;  %15815 = vmatprep.subr.mxu0 %v16815_v1  ;;  %v14914_v36 = vld [vmem:[%s16931_s5 + $0x78] sm:$0xff] }
 0x19c   : > { %15876 = vmatpush3.msra.mxu1 %v16961_v24  ;;  %15877 = vmatprep.mubr.msk.f32.mxu1 %vm16816_vm0, %v16815_v1  ;;  %v11962_v39 = vsel %vm189_vm1, %v14914_v36, 0 }
 0x19d   : > { %15880 = vmatprep.subr.mxu1 %v16815_v1  ;;  %15813 = vmatmul.mubr.f32.vlgmr.msra.gmra.mrb[8].mxu0 %v7508_v38  ;;  %v14905_v38 = vld [vmem:[%s16931_s5 + $0x38] sm:$0xff] }
 0x19e   : > { %15816 = vmatpush3.msra.mxu0 %v16961_v24  ;;  %15817 = vmatprep.mubr.msk.f32.mxu0 %vm16816_vm0, %v16815_v1 }
 0x19f   : > { %15820 = vmatprep.subr.mxu0 %v16815_v1 }
 0x1a3   : > { %15878 = vmatmul.mubr.f32.vlgmr.msra.gmra.mrb[8].mxu1 %v17561_v27 }
 0x1a4   : > { %15881 = vmatpush3.msra.mxu1 %v16946_v12  ;;  %15882 = vmatprep.mubr.msk.f32.mxu1 %vm16816_vm0, %v16815_v1 }
 0x1a5   : > { %15885 = vmatprep.subr.mxu1 %v16815_v1  ;;  %15818 = vmatmul.mubr.f32.vlgmr.msra.gmra.mrb[8].mxu0 %v17567_v28 }
 0x1a6   : > { %15821 = vmatpush3.msra.mxu0 %v16946_v12  ;;  %15822 = vmatprep.mubr.msk.f32.mxu0 %vm16816_vm0, %v16815_v1 }
 0x1a7   : > { %15825 = vmatprep.subr.mxu0 %v16815_v1 }
 0x1ab   : > { %15883 = vmatmul.mubr.f32.vlgmr.msra.gmra.mrb[8].mxu1 %v8409_v29 }
 0x1ac   : > { %15886 = vmatpush3.msk.msra.mxu1 %vm16924_vm2, %v16817_v7  ;;  %15887 = vmatprep.mubr.msk.f32.mxu1 %vm16816_vm0, %v16815_v1 }
 0x1ad   : > { %15890 = vmatprep.subr.mxu1 %v16815_v1  ;;  %15823 = vmatmul.mubr.f32.vlgmr.msra.gmra.mrb[8].mxu0 %v7505_v30 }
 0x1ae   : > { %15826 = vmatpush3.msk.msra.mxu0 %vm16924_vm2, %v16817_v7  ;;  %15827 = vmatprep.mubr.msk.f32.mxu0 %vm16816_vm0, %v16815_v1 }
 0x1af   : > { %15830 = vmatprep.subr.mxu0 %v16815_v1 }
 0x1b2   : > { %v3800_v41 = vpop.f32.mrb[2].mxu1 }
 0x1b3   : > { %v2896_v42 = vpop.f32.mrb[2].mxu0  ;;  %15888 = vmatmul.mubr.f32.vlgmr.msra.gmra.mrb[8].mxu1 %v8410_v32  ;;  %3805 = vrot.lane.b32.xlu0 %v3800_v41, %s16818_s15  ;;  %v15569_v43 = vpop.f32.mrb[3].mxu1  ;;  %v11058_v41 = vsel %vm189_vm1, %v14905_v38, 0 }
 0x1b4   : > { %14822 = vst.msk [vmem:[%s17478_s18 + $0x8] sm:$0xff] %vm1088_vm4, %v2896_v42  ;;  %v15509_v44 = vpop.f32.mrb[3].mxu0  ;;  %15891 = vmatpush3.msra.mxu1 %v16955_v16  ;;  %15892 = vmatprep.mubr.msk.f32.mxu1 %vm16816_vm0, %v16815_v1  ;;  %v17875_v42 = vand.u32 4294901760, %v11962_v39  ;;  %v17881_v43 = vand.u32 4294901760, %v11058_v41 }
 0x1b5   : > { %15895 = vmatprep.subr.mxu1 %v16815_v1  ;;  %15828 = vmatmul.mubr.f32.vlgmr.msra.gmra.mrb[8].mxu0 %v7506_v33 }
 0x1b6   : > { %15831 = vmatpush3.msra.mxu0 %v16955_v16  ;;  %15832 = vmatprep.mubr.msk.f32.mxu0 %vm16816_vm0, %v16815_v1  ;;  %v12031_v44 = vsub.f32 %v11962_v39, %v17875_v42  ;;  %v11127_v45 = vsub.f32 %v11058_v41, %v17881_v43 }
 0x1b7   : > { %15835 = vmatprep.subr.mxu0 %v16815_v1 }
 0x1b8   : > { %v12032_v47 = vand.u32 4294901760, %v12031_v44  ;;  %v11128_v48 = vand.u32 4294901760, %v11127_v45 }
 0x1bb   : > { %15893 = vmatmul.mubr.f32.vlgmr.msra.gmra.mrb[8].mxu1 %v17561_v27 }
 0x1bc   : > { %15896 = vmatpush3.msk.msra.mxu1 %vm16924_vm2, %v16817_v7  ;;  %15897 = vmatprep.mubr.msk.f32.mxu1 %vm16816_vm0, %v16815_v1 }
 0x1bd   : > { %15900 = vmatprep.subr.mxu1 %v16815_v1  ;;  %15833 = vmatmul.mubr.f32.vlgmr.msra.gmra.mrb[8].mxu0 %v17567_v28 }
 0x1be   : > { %15836 = vmatpush3.msk.msra.mxu0 %vm16924_vm2, %v16817_v7  ;;  %15837 = vmatprep.mubr.msk.f32.mxu0 %vm16816_vm0, %v16815_v1 }
 0x1bf   : > { %15840 = vmatprep.subr.mxu0 %v16815_v1 }
 0x1c3   : > { %15898 = vmatmul.mubr.f32.vlgmr.msra.gmra.mrb[8].mxu1 %v17561_v27  ;;  %v9765_v27 = vsub.f32 %v9696_v22, %v17807_v25 }
 0x1c4   : > { %15901 = vmatpush3.msk.msra.mxu1 %vm17005_vm3, %v16817_v7  ;;  %15902 = vmatprep.mubr.msk.f32.mxu1 %vm16816_vm0, %v16815_v1 }
 0x1c5   : > { %15905 = vmatprep.subr.mxu1 %v16815_v1  ;;  %15838 = vmatmul.mubr.f32.vlgmr.msra.gmra.mrb[8].mxu0 %v17567_v28  ;;  %v10670_v28 = vand.u32 4294901760, %v10669_v26  ;;  %v9766_v29 = vand.u32 4294901760, %v9765_v27 }
 0x1c6   : > { %15841 = vmatpush3.msk.msra.mxu0 %vm17005_vm3, %v16817_v7  ;;  %15842 = vmatprep.mubr.msk.f32.mxu0 %vm16816_vm0, %v16815_v1 }
 0x1c7   : > { %15845 = vmatprep.subr.mxu0 %v16815_v1  ;;  %v10671_v30 = vsub.f32 %v10669_v26, %v10670_v28  ;;  %v9767_v32 = vsub.f32 %v9765_v27, %v9766_v29 }
 0x1c9   : > { %v1994_v58 = vpop.permute.xlu0 %1993  ;;  %v10672_v33 = vand.u32 4294901760, %v10671_v30  ;;  %v9768_v35 = vand.u32 4294901760, %v9767_v32 }
 0x1ca   : > { %1997 = vst.msk [vmem:[%s17478_s18] sm:$0xff] %vm1996_vm5, %v1994_v58 }
 0x1cb   : > { %15903 = vmatmul.mubr.f32.vlgmr.msra.gmra.mrb[8].mxu1 %v8861_v57 }
 0x1cc   : > { %15906 = vmatpush3.msra.mxu1 %v17056_v46  ;;  %15907 = vmatprep.mubr.msk.f32.mxu1 %vm16816_vm0, %v16815_v1 }
 0x1cd   : > { %15910 = vmatprep.subr.mxu1 %v16815_v1  ;;  %15843 = vmatmul.mubr.f32.vlgmr.msra.gmra.mrb[8].mxu0 %v7957_v59 }
 0x1ce   : > { %15846 = vmatpush3.msra.mxu0 %v17056_v46  ;;  %15847 = vmatprep.mubr.msk.f32.mxu0 %vm16816_vm0, %v16815_v1 }
 0x1cf   : > { %15850 = vmatprep.subr.mxu0 %v16815_v1 }
 0x1d3   : > { %15908 = vmatmul.mubr.f32.vlgmr.msra.gmra.mrb[8].mxu1 %v17647_v49 }
 0x1d4   : > { %15911 = vmatpush3.msra.mxu1 %v17028_v37  ;;  %15912 = vmatprep.mubr.msk.f32.mxu1 %vm16816_vm0, %v16815_v1 }
 0x1d5   : > { %15915 = vmatprep.subr.mxu1 %v16815_v1  ;;  %15848 = vmatmul.mubr.f32.vlgmr.msra.gmra.mrb[8].mxu0 %v17650_v50 }
 0x1d6   : > { %15851 = vmatpush3.msra.mxu0 %v17028_v37  ;;  %15852 = vmatprep.mubr.msk.f32.mxu0 %vm16816_vm0, %v16815_v1 }
 0x1d7   : > { %15855 = vmatprep.subr.mxu0 %v16815_v1 }
 0x1db   : > { %15913 = vmatmul.mubr.f32.vlgmr.msra.gmra.mrb[8].mxu1 %v8858_v51 }
 0x1dc   : > { %15916 = vmatpush3.msk.msra.mxu1 %vm17005_vm3, %v16817_v7  ;;  %15917 = vmatprep.mubr.msk.f32.mxu1 %vm16816_vm0, %v16815_v1 }
 0x1dd   : > { %15920 = vmatprep.subr.mxu1 %v16815_v1  ;;  %15853 = vmatmul.mubr.f32.vlgmr.msra.gmra.mrb[8].mxu0 %v7954_v52 }
 0x1de   : > { %15856 = vmatpush3.msk.msra.mxu0 %vm17005_vm3, %v16817_v7  ;;  %15857 = vmatprep.mubr.msk.f32.mxu0 %vm16816_vm0, %v16815_v1 }
 0x1df   : > { %15860 = vmatprep.subr.mxu0 %v16815_v1 }
 0x1e3   : > { %15918 = vmatmul.mubr.f32.vlgmr.msra.gmra.mrb[8].mxu1 %v8859_v53  ;;  %v14913_v53 = vld [vmem:[%s16931_s5 + $0x58] sm:$0xff] }
 0x1e4   : > { %15921 = vmatpush3.msra.mxu1 %v17038_v40  ;;  %15922 = vmatprep.mubr.msk.f32.mxu1 %vm16816_vm0, %v16815_v1  ;;  %v12411_v58 = vsel %vm189_vm1, %v14913_v53, 0 }
 0x1e5   : > { %15925 = vmatprep.subr.mxu1 %v16815_v1  ;;  %15858 = vmatmul.mubr.f32.vlgmr.msra.gmra.mrb[8].mxu0 %v7955_v54  ;;  %v17961_v61 = vand.u32 4294901760, %v12411_v58 }
 0x1e6   : > { %15861 = vmatpush3.msra.mxu0 %v17038_v40  ;;  %15862 = vmatprep.mubr.msk.f32.mxu0 %vm16816_vm0, %v16815_v1 }
 0x1e7   : > { %15865 = vmatprep.subr.mxu0 %v16815_v1  ;;  %v12480_v63 = vsub.f32 %v12411_v58, %v17961_v61 }
 0x1eb   : > { %15923 = vmatmul.mubr.f32.vlgmr.msra.gmra.mrb[8].mxu1 %v17647_v49 }
 0x1ec   : > { %15926 = vmatpush3.msk.msra.mxu1 %vm17005_vm3, %v16817_v7  ;;  %15927 = vmatprep.mubr.msk.f32.mxu1 %vm16816_vm0, %v16815_v1 }
 0x1ed   : > { %15990 = vmatprep.subr.mxu1 %v16815_v1  ;;  %15863 = vmatmul.mubr.f32.vlgmr.msra.gmra.mrb[8].mxu0 %v17650_v50 }
 0x1ee   : > { %15866 = vmatpush3.msk.msra.mxu0 %vm17005_vm3, %v16817_v7  ;;  %15867 = vmatprep.mubr.msk.f32.mxu0 %vm16816_vm0, %v16815_v1 }
 0x1ef   : > { %15930 = vmatprep.subr.mxu0 %v16815_v1 }
 0x1f3   : > { %15928 = vmatmul.mubr.f32.vlgmr.msra.gmra.mrb[8].mxu1 %v17647_v49  ;;  %v12033_v49 = vsub.f32 %v12031_v44, %v12032_v47 }
 0x1f4   : > { %15991 = vmatpush3.msk.msra.mxu1 %vm16924_vm2, %v16817_v7  ;;  %15992 = vmatprep.mubr.msk.f32.mxu1 %vm16816_vm0, %v16815_v1 }
 0x1f5   : > { %15995 = vmatprep.subr.mxu1 %v16815_v1  ;;  %15868 = vmatmul.mubr.f32.vlgmr.msra.gmra.mrb[8].mxu0 %v17650_v50  ;;  %v11129_v50 = vsub.f32 %v11127_v45, %v11128_v48  ;;  %v12034_v51 = vand.u32 4294901760, %v12033_v49 }
 0x1f6   : > { %15931 = vmatpush3.msk.msra.mxu0 %vm16924_vm2, %v16817_v7  ;;  %15932 = vmatprep.mubr.msk.f32.mxu0 %vm16816_vm0, %v16815_v1 }
 0x1f7   : > { %15993 = vmatmul.mubr.f32.vlgmr.msra.gmra.mrb[10].mxu1 %v10223_v11  ;;  %15935 = vmatprep.subr.mxu0 %v16815_v1  ;;  %v11130_v52 = vand.u32 4294901760, %v11129_v50  ;;  %v14932_v11 = vld [vmem:[%s16931_s5 + $0xf8] sm:$0xff] }
 0x1f8   : > { %15996 = vmatpush3.msra.mxu1 %v16961_v24  ;;  %15997 = vmatprep.mubr.msk.f32.mxu1 %vm16816_vm0, %v16815_v1  ;;  %v13773_v14 = vsel %vm189_vm1, %v14932_v11, 0 }
 0x1f9   : > { %16000 = vmatprep.subr.mxu1 %v16815_v1  ;;  %15933 = vmatmul.mubr.f32.vlgmr.msra.gmra.mrb[10].mxu0 %v9319_v13  ;;  %v14923_v13 = vld [vmem:[%s16931_s5 + $0xb8] sm:$0xff] }
 0x1fa   : > { %15936 = vmatpush3.msra.mxu0 %v16961_v24  ;;  %15937 = vmatprep.mubr.msk.f32.mxu0 %vm16816_vm0, %v16815_v1 }
 0x1fb   : > { %15940 = vmatprep.subr.mxu0 %v16815_v1 }
 0x1ff   : > { %15998 = vmatmul.mubr.f32.vlgmr.msra.gmra.mrb[10].mxu1 %v17718_v0 }
 0x200   : > { %16001 = vmatpush3.msra.mxu1 %v16946_v12  ;;  %16002 = vmatprep.mubr.msk.f32.mxu1 %vm16816_vm0, %v16815_v1 }
 0x201   : > { %16005 = vmatprep.subr.mxu1 %v16815_v1  ;;  %15938 = vmatmul.mubr.f32.vlgmr.msra.gmra.mrb[10].mxu0 %v17724_v2 }
 0x202   : > { %15941 = vmatpush3.msra.mxu0 %v16946_v12  ;;  %15942 = vmatprep.mubr.msk.f32.mxu0 %vm16816_vm0, %v16815_v1 }
 0x203   : > { %15945 = vmatprep.subr.mxu0 %v16815_v1 }
 0x207   : > { %16003 = vmatmul.mubr.f32.vlgmr.msra.gmra.mrb[10].mxu1 %v10220_v3 }
 0x208   : > { %16006 = vmatpush3.msk.msra.mxu1 %vm16924_vm2, %v16817_v7  ;;  %16007 = vmatprep.mubr.msk.f32.mxu1 %vm16816_vm0, %v16815_v1 }
 0x209   : > { %16010 = vmatprep.subr.mxu1 %v16815_v1  ;;  %15943 = vmatmul.mubr.f32.vlgmr.msra.gmra.mrb[10].mxu0 %v9316_v4 }
 0x20a   : > { %15946 = vmatpush3.msk.msra.mxu0 %vm16924_vm2, %v16817_v7  ;;  %15947 = vmatprep.mubr.msk.f32.mxu0 %vm16816_vm0, %v16815_v1 }
 0x20b   : > { %15950 = vmatprep.subr.mxu0 %v16815_v1 }
 0x20e   : > { %v5611_v15 = vpop.f32.mrb[4].mxu1 }
 0x20f   : > { %v4707_v17 = vpop.f32.mrb[4].mxu0  ;;  %16008 = vmatmul.mubr.f32.vlgmr.msra.gmra.mrb[10].mxu1 %v10221_v5  ;;  %5616 = vrot.lane.b32.xlu1 %v5611_v15, %s16818_s15  ;;  %v15689_v18 = vpop.f32.mrb[5].mxu1  ;;  %v12869_v15 = vsel %vm189_vm1, %v14923_v13, 0 }
 0x210   : > { %14840 = vst.msk [vmem:[%s17478_s18 + $0x10] sm:$0xff] %vm1088_vm4, %v4707_v17  ;;  %v15629_v19 = vpop.f32.mrb[5].mxu0  ;;  %16011 = vmatpush3.msra.mxu1 %v16955_v16  ;;  %16012 = vmatprep.mubr.msk.f32.mxu1 %vm16816_vm0, %v16815_v1  ;;  %v18032_v17 = vand.u32 4294901760, %v13773_v14  ;;  %v18038_v18 = vand.u32 4294901760, %v12869_v15 }
 0x211   : > { %16015 = vmatprep.subr.mxu1 %v16815_v1  ;;  %15948 = vmatmul.mubr.f32.vlgmr.msra.gmra.mrb[10].mxu0 %v9317_v8 }
 0x212   : > { %15951 = vmatpush3.msra.mxu0 %v16955_v16  ;;  %15952 = vmatprep.mubr.msk.f32.mxu0 %vm16816_vm0, %v16815_v1  ;;  %v13842_v19 = vsub.f32 %v13773_v14, %v18032_v17  ;;  %v12938_v20 = vsub.f32 %v12869_v15, %v18038_v18 }
 0x213   : > { %15955 = vmatprep.subr.mxu0 %v16815_v1 }
 0x214   : > { %v13843_v21 = vand.u32 4294901760, %v13842_v19  ;;  %v12939_v22 = vand.u32 4294901760, %v12938_v20 }
 0x217   : > { %16013 = vmatmul.mubr.f32.vlgmr.msra.gmra.mrb[10].mxu1 %v17718_v0 }
 0x218   : > { %16016 = vmatpush3.msk.msra.mxu1 %vm16924_vm2, %v16817_v7  ;;  %16017 = vmatprep.mubr.msk.f32.mxu1 %vm16816_vm0, %v16815_v1 }
 0x219   : > { %16020 = vmatprep.subr.mxu1 %v16815_v1  ;;  %15953 = vmatmul.mubr.f32.vlgmr.msra.gmra.mrb[10].mxu0 %v17724_v2 }
 0x21a   : > { %15956 = vmatpush3.msk.msra.mxu0 %vm16924_vm2, %v16817_v7  ;;  %15957 = vmatprep.mubr.msk.f32.mxu0 %vm16816_vm0, %v16815_v1 }
 0x21b   : > { %15960 = vmatprep.subr.mxu0 %v16815_v1 }
 0x21f   : > { %16018 = vmatmul.mubr.f32.vlgmr.msra.gmra.mrb[10].mxu1 %v17718_v0  ;;  %v11576_v0 = vsub.f32 %v11507_v60, %v17964_v62 }
 0x220   : > { %16021 = vmatpush3.msk.msra.mxu1 %vm17005_vm3, %v16817_v7  ;;  %16022 = vmatprep.mubr.msk.f32.mxu1 %vm16816_vm0, %v16815_v1 }
 0x221   : > { %16025 = vmatprep.subr.mxu1 %v16815_v1  ;;  %15958 = vmatmul.mubr.f32.vlgmr.msra.gmra.mrb[10].mxu0 %v17724_v2  ;;  %v12481_v2 = vand.u32 4294901760, %v12480_v63  ;;  %v11577_v3 = vand.u32 4294901760, %v11576_v0 }
 0x222   : > { %15961 = vmatpush3.msk.msra.mxu0 %vm17005_vm3, %v16817_v7  ;;  %15962 = vmatprep.mubr.msk.f32.mxu0 %vm16816_vm0, %v16815_v1 }
 0x223   : > { %15965 = vmatprep.subr.mxu0 %v16815_v1  ;;  %v12482_v4 = vsub.f32 %v12480_v63, %v12481_v2  ;;  %v11578_v5 = vsub.f32 %v11576_v0, %v11577_v3 }
 0x225   : > { %v3806_v34 = vpop.permute.xlu0 %3805  ;;  %v12483_v8 = vand.u32 4294901760, %v12482_v4  ;;  %v11579_v10 = vand.u32 4294901760, %v11578_v5 }
 0x226   : > { %14831 = vst.msk [vmem:[%s17478_s18 + $0x8] sm:$0xff] %vm1996_vm5, %v3806_v34 }
 0x227   : > { %16023 = vmatmul.mubr.f32.vlgmr.msra.gmra.mrb[10].mxu1 %v10672_v33 }
 0x228   : > { %16026 = vmatpush3.msra.mxu1 %v17056_v46  ;;  %16027 = vmatprep.mubr.msk.f32.mxu1 %vm16816_vm0, %v16815_v1 }
 0x229   : > { %16030 = vmatprep.subr.mxu1 %v16815_v1  ;;  %15963 = vmatmul.mubr.f32.vlgmr.msra.gmra.mrb[10].mxu0 %v9768_v35 }
 0x22a   : > { %15966 = vmatpush3.msra.mxu0 %v17056_v46  ;;  %15967 = vmatprep.mubr.msk.f32.mxu0 %vm16816_vm0, %v16815_v1 }
 0x22b   : > { %15970 = vmatprep.subr.mxu0 %v16815_v1 }
 0x22f   : > { %16028 = vmatmul.mubr.f32.vlgmr.msra.gmra.mrb[10].mxu1 %v17804_v23 }
 0x230   : > { %16031 = vmatpush3.msra.mxu1 %v17028_v37  ;;  %16032 = vmatprep.mubr.msk.f32.mxu1 %vm16816_vm0, %v16815_v1 }
 0x231   : > { %16035 = vmatprep.subr.mxu1 %v16815_v1  ;;  %15968 = vmatmul.mubr.f32.vlgmr.msra.gmra.mrb[10].mxu0 %v17807_v25 }
 0x232   : > { %15971 = vmatpush3.msra.mxu0 %v17028_v37  ;;  %15972 = vmatprep.mubr.msk.f32.mxu0 %vm16816_vm0, %v16815_v1 }
 0x233   : > { %15975 = vmatprep.subr.mxu0 %v16815_v1 }
 0x237   : > { %16033 = vmatmul.mubr.f32.vlgmr.msra.gmra.mrb[10].mxu1 %v10669_v26 }
 0x238   : > { %16036 = vmatpush3.msk.msra.mxu1 %vm17005_vm3, %v16817_v7  ;;  %16037 = vmatprep.mubr.msk.f32.mxu1 %vm16816_vm0, %v16815_v1 }
 0x239   : > { %16040 = vmatprep.subr.mxu1 %v16815_v1  ;;  %15973 = vmatmul.mubr.f32.vlgmr.msra.gmra.mrb[10].mxu0 %v9765_v27 }
 0x23a   : > { %15976 = vmatpush3.msk.msra.mxu0 %vm17005_vm3, %v16817_v7  ;;  %15977 = vmatprep.mubr.msk.f32.mxu0 %vm16816_vm0, %v16815_v1 }
 0x23b   : > { %15980 = vmatprep.subr.mxu0 %v16815_v1 }
 0x23f   : > { %16038 = vmatmul.mubr.f32.vlgmr.msra.gmra.mrb[10].mxu1 %v10670_v28 }
 0x240   : > { %16041 = vmatpush3.msra.mxu1 %v17038_v40  ;;  %16042 = vmatprep.mubr.msk.f32.mxu1 %vm16816_vm0, %v16815_v1 }
 0x241   : > { %16045 = vmatprep.subr.mxu1 %v16815_v1  ;;  %15978 = vmatmul.mubr.f32.vlgmr.msra.gmra.mrb[10].mxu0 %v9766_v29  ;;  %v14922_v29 = vld [vmem:[%s16931_s5 + $0x98] sm:$0xff] }
 0x242   : > { %15981 = vmatpush3.msra.mxu0 %v17038_v40  ;;  %15982 = vmatprep.mubr.msk.f32.mxu0 %vm16816_vm0, %v16815_v1  ;;  %v13318_v34 = vsel %vm189_vm1, %v14922_v29, 0 }
 0x243   : > { %15985 = vmatprep.subr.mxu0 %v16815_v1  ;;  %v18121_v36 = vand.u32 4294901760, %v13318_v34 }
 0x247   : > { %16043 = vmatmul.mubr.f32.vlgmr.msra.gmra.mrb[10].mxu1 %v17804_v23 }
 0x248   : > { %16046 = vmatpush3.msk.msra.mxu1 %vm17005_vm3, %v16817_v7  ;;  %16047 = vmatprep.mubr.msk.f32.mxu1 %vm16816_vm0, %v16815_v1 }
 0x249   : > { %16110 = vmatprep.subr.mxu1 %v16815_v1  ;;  %15983 = vmatmul.mubr.f32.vlgmr.msra.gmra.mrb[10].mxu0 %v17807_v25 }
 0x24a   : > { %15986 = vmatpush3.msk.msra.mxu0 %vm17005_vm3, %v16817_v7  ;;  %15987 = vmatprep.mubr.msk.f32.mxu0 %vm16816_vm0, %v16815_v1 }
 0x24b   : > { %16050 = vmatprep.subr.mxu0 %v16815_v1 }
 0x24f   : > { %16048 = vmatmul.mubr.f32.vlgmr.msra.gmra.mrb[10].mxu1 %v17804_v23  ;;  %v13844_v23 = vsub.f32 %v13842_v19, %v13843_v21 }
 0x250   : > { %16111 = vmatpush3.msk.msra.mxu1 %vm16924_vm2, %v16817_v7  ;;  %16112 = vmatprep.mubr.msk.f32.mxu1 %vm16816_vm0, %v16815_v1 }
 0x251   : > { %16115 = vmatprep.subr.mxu1 %v16815_v1  ;;  %15988 = vmatmul.mubr.f32.vlgmr.msra.gmra.mrb[10].mxu0 %v17807_v25  ;;  %v12940_v25 = vsub.f32 %v12938_v20, %v12939_v22  ;;  %v13845_v26 = vand.u32 4294901760, %v13844_v23 }
 0x252   : > { %16051 = vmatpush3.msk.msra.mxu0 %vm16924_vm2, %v16817_v7  ;;  %16052 = vmatprep.mubr.msk.f32.mxu0 %vm16816_vm0, %v16815_v1 }
 0x253   : > { %16113 = vmatmul.mubr.f32.vlgmr.msra.gmra.mrb[12].mxu1 %v12034_v51  ;;  %16055 = vmatprep.subr.mxu0 %v16815_v1  ;;  %v12941_v27 = vand.u32 4294901760, %v12940_v25 }
 0x254   : > { %16116 = vmatpush3.msra.mxu1 %v16961_v24  ;;  %16117 = vmatprep.mubr.msk.f32.mxu1 %vm16816_vm0, %v16815_v1 }
 0x255   : > { %16120 = vmatprep.subr.mxu1 %v16815_v1  ;;  %16053 = vmatmul.mubr.f32.vlgmr.msra.gmra.mrb[12].mxu0 %v11130_v52 }
 0x256   : > { %16056 = vmatpush3.msra.mxu0 %v16961_v24  ;;  %16057 = vmatprep.mubr.msk.f32.mxu0 %vm16816_vm0, %v16815_v1 }
 0x257   : > { %16060 = vmatprep.subr.mxu0 %v16815_v1 }
 0x25b   : > { %16118 = vmatmul.mubr.f32.vlgmr.msra.gmra.mrb[12].mxu1 %v17875_v42 }
 0x25c   : > { %16121 = vmatpush3.msra.mxu1 %v16946_v12  ;;  %16122 = vmatprep.mubr.msk.f32.mxu1 %vm16816_vm0, %v16815_v1 }
 0x25d   : > { %16125 = vmatprep.subr.mxu1 %v16815_v1  ;;  %16058 = vmatmul.mubr.f32.vlgmr.msra.gmra.mrb[12].mxu0 %v17881_v43 }
 0x25e   : > { %16061 = vmatpush3.msra.mxu0 %v16946_v12  ;;  %16062 = vmatprep.mubr.msk.f32.mxu0 %vm16816_vm0, %v16815_v1 }
 0x25f   : > { %16065 = vmatprep.subr.mxu0 %v16815_v1 }
 0x263   : > { %16123 = vmatmul.mubr.f32.vlgmr.msra.gmra.mrb[12].mxu1 %v12031_v44 }
 0x264   : > { %16126 = vmatpush3.msk.msra.mxu1 %vm16924_vm2, %v16817_v7  ;;  %16127 = vmatprep.mubr.msk.f32.mxu1 %vm16816_vm0, %v16815_v1 }
 0x265   : > { %16130 = vmatprep.subr.mxu1 %v16815_v1  ;;  %16063 = vmatmul.mubr.f32.vlgmr.msra.gmra.mrb[12].mxu0 %v11127_v45 }
 0x266   : > { %16066 = vmatpush3.msk.msra.mxu0 %vm16924_vm2, %v16817_v7  ;;  %16067 = vmatprep.mubr.msk.f32.mxu0 %vm16816_vm0, %v16815_v1 }
 0x267   : > { %16070 = vmatprep.subr.mxu0 %v16815_v1 }
 0x26a   : > { %v7422_v54 = vpop.f32.mrb[6].mxu1 }
 0x26b   : > { %16128 = vmatmul.mubr.f32.vlgmr.msra.gmra.mrb[12].mxu1 %v12032_v47  ;;  %7427 = vrot.lane.b32.xlu1 %v7422_v54, %s16818_s15  ;;  %v15809_v55 = vpop.f32.mrb[7].mxu1 }
 0x26c   : > { %16131 = vmatpush3.msra.mxu1 %v16955_v16  ;;  %16132 = vmatprep.mubr.msk.f32.mxu1 %vm16816_vm0, %v16815_v1  ;;  %v6518_v57 = vpop.f32.mrb[6].mxu0 }
 0x26d   : > { %16135 = vmatprep.subr.mxu1 %v16815_v1  ;;  %14858 = vst.msk [vmem:[%s17478_s18 + $0x18] sm:$0xff] %vm1088_vm4, %v6518_v57  ;;  %v15749_v59 = vpop.f32.mrb[7].mxu0  ;;  %16068 = vmatmul.mubr.f32.vlgmr.msra.gmra.mrb[12].mxu0 %v11128_v48 }
 0x26e   : > { %16071 = vmatpush3.msra.mxu0 %v16955_v16  ;;  %16072 = vmatprep.mubr.msk.f32.mxu0 %vm16816_vm0, %v16815_v1 }
 0x26f   : > { %16075 = vmatprep.subr.mxu0 %v16815_v1 }
 0x273   : > { %16133 = vmatmul.mubr.f32.vlgmr.msra.gmra.mrb[12].mxu1 %v17875_v42 }
 0x274   : > { %16136 = vmatpush3.msk.msra.mxu1 %vm16924_vm2, %v16817_v7  ;;  %16137 = vmatprep.mubr.msk.f32.mxu1 %vm16816_vm0, %v16815_v1 }
 0x275   : > { %16140 = vmatprep.subr.mxu1 %v16815_v1  ;;  %16073 = vmatmul.mubr.f32.vlgmr.msra.gmra.mrb[12].mxu0 %v17881_v43 }
 0x276   : > { %16076 = vmatpush3.msk.msra.mxu0 %vm16924_vm2, %v16817_v7  ;;  %16077 = vmatprep.mubr.msk.f32.mxu0 %vm16816_vm0, %v16815_v1 }
 0x277   : > { %16080 = vmatprep.subr.mxu0 %v16815_v1 }
 0x27b   : > { %16138 = vmatmul.mubr.f32.vlgmr.msra.gmra.mrb[12].mxu1 %v17875_v42 }
 0x27c   : > { %16141 = vmatpush3.msk.msra.mxu1 %vm17005_vm3, %v16817_v7  ;;  %16142 = vmatprep.mubr.msk.f32.mxu1 %vm16816_vm0, %v16815_v1 }
 0x27d   : > { %16145 = vmatprep.subr.mxu1 %v16815_v1  ;;  %16078 = vmatmul.mubr.f32.vlgmr.msra.gmra.mrb[12].mxu0 %v17881_v43 }
 0x27e   : > { %16081 = vmatpush3.msk.msra.mxu0 %vm17005_vm3, %v16817_v7  ;;  %16082 = vmatprep.mubr.msk.f32.mxu0 %vm16816_vm0, %v16815_v1 }
 0x27f   : > { %16085 = vmatprep.subr.mxu0 %v16815_v1 }
 0x281   : > { %v5617_v9 = vpop.permute.xlu1 %5616 }
 0x282   : > { %14849 = vst.msk [vmem:[%s17478_s18 + $0x10] sm:$0xff] %vm1996_vm5, %v5617_v9 }
 0x283   : > { %16143 = vmatmul.mubr.f32.vlgmr.msra.gmra.mrb[12].mxu1 %v12483_v8 }
 0x284   : > { %16146 = vmatpush3.msra.mxu1 %v17056_v46  ;;  %16147 = vmatprep.mubr.msk.f32.mxu1 %vm16816_vm0, %v16815_v1 }
 0x285   : > { %16150 = vmatprep.subr.mxu1 %v16815_v1  ;;  %16083 = vmatmul.mubr.f32.vlgmr.msra.gmra.mrb[12].mxu0 %v11579_v10 }
 0x286   : > { %16086 = vmatpush3.msra.mxu0 %v17056_v46  ;;  %16087 = vmatprep.mubr.msk.f32.mxu0 %vm16816_vm0, %v16815_v1 }
 0x287   : > { %16090 = vmatprep.subr.mxu0 %v16815_v1 }
 0x28b   : > { %16148 = vmatmul.mubr.f32.vlgmr.msra.gmra.mrb[12].mxu1 %v17961_v61 }
 0x28c   : > { %16151 = vmatpush3.msra.mxu1 %v17028_v37  ;;  %16152 = vmatprep.mubr.msk.f32.mxu1 %vm16816_vm0, %v16815_v1 }
 0x28d   : > { %16155 = vmatprep.subr.mxu1 %v16815_v1  ;;  %16088 = vmatmul.mubr.f32.vlgmr.msra.gmra.mrb[12].mxu0 %v17964_v62 }
 0x28e   : > { %16091 = vmatpush3.msra.mxu0 %v17028_v37  ;;  %16092 = vmatprep.mubr.msk.f32.mxu0 %vm16816_vm0, %v16815_v1 }
 0x28f   : > { %16095 = vmatprep.subr.mxu0 %v16815_v1 }
 0x293   : > { %16153 = vmatmul.mubr.f32.vlgmr.msra.gmra.mrb[12].mxu1 %v12480_v63 }
 0x294   : > { %16156 = vmatpush3.msk.msra.mxu1 %vm17005_vm3, %v16817_v7  ;;  %16157 = vmatprep.mubr.msk.f32.mxu1 %vm16816_vm0, %v16815_v1 }
 0x295   : > { %16160 = vmatprep.subr.mxu1 %v16815_v1  ;;  %16093 = vmatmul.mubr.f32.vlgmr.msra.gmra.mrb[12].mxu0 %v11576_v0 }
 0x296   : > { %16096 = vmatpush3.msk.msra.mxu0 %vm17005_vm3, %v16817_v7  ;;  %16097 = vmatprep.mubr.msk.f32.mxu0 %vm16816_vm0, %v16815_v1 }
 0x297   : > { %16100 = vmatprep.subr.mxu0 %v16815_v1 }
 0x29b   : > { %16158 = vmatmul.mubr.f32.vlgmr.msra.gmra.mrb[12].mxu1 %v12481_v2 }
 0x29c   : > { %16161 = vmatpush3.msra.mxu1 %v17038_v40  ;;  %16162 = vmatprep.mubr.msk.f32.mxu1 %vm16816_vm0, %v16815_v1 }
 0x29d   : > { %16165 = vmatprep.subr.mxu1 %v16815_v1  ;;  %16098 = vmatmul.mubr.f32.vlgmr.msra.gmra.mrb[12].mxu0 %v11577_v3 }
 0x29e   : > { %16101 = vmatpush3.msra.mxu0 %v17038_v40  ;;  %16102 = vmatprep.mubr.msk.f32.mxu0 %vm16816_vm0, %v16815_v1 }
 0x29f   : > { %16105 = vmatprep.subr.mxu0 %v16815_v1 }
 0x2a3   : > { %16163 = vmatmul.mubr.f32.vlgmr.msra.gmra.mrb[12].mxu1 %v17961_v61 }
 0x2a4   : > { %16166 = vmatpush3.msk.msra.mxu1 %vm17005_vm3, %v16817_v7  ;;  %16167 = vmatprep.mubr.msk.f32.mxu1 %vm16816_vm0, %v16815_v1 }
 0x2a5   : > { %16230 = vmatprep.subr.mxu1 %v16815_v1  ;;  %16103 = vmatmul.mubr.f32.vlgmr.msra.gmra.mrb[12].mxu0 %v17964_v62 }
 0x2a6   : > { %16106 = vmatpush3.msk.msra.mxu0 %vm17005_vm3, %v16817_v7  ;;  %16107 = vmatprep.mubr.msk.f32.mxu0 %vm16816_vm0, %v16815_v1 }
 0x2a7   : > { %16170 = vmatprep.subr.mxu0 %v16815_v1 }
 0x2ab   : > { %16168 = vmatmul.mubr.f32.vlgmr.msra.gmra.mrb[12].mxu1 %v17961_v61 }
 0x2ac   : > { %16231 = vmatpush3.msk.msra.mxu1 %vm16924_vm2, %v16817_v7  ;;  %16232 = vmatprep.mubr.msk.f32.mxu1 %vm16816_vm0, %v16815_v1 }
 0x2ad   : > { %16235 = vmatprep.subr.mxu1 %v16815_v1  ;;  %16108 = vmatmul.mubr.f32.vlgmr.msra.gmra.mrb[12].mxu0 %v17964_v62 }
 0x2ae   : > { %16171 = vmatpush3.msk.msra.mxu0 %vm16924_vm2, %v16817_v7  ;;  %16172 = vmatprep.mubr.msk.f32.mxu0 %vm16816_vm0, %v16815_v1 }
 0x2af   : > { %16233 = vmatmul.mubr.f32.vlgmr.msra.gmra.mrb[14].mxu1 %v13845_v26  ;;  %16175 = vmatprep.subr.mxu0 %v16815_v1 }
 0x2b0   : > { %16236 = vmatpush3.msra.mxu1 %v16961_v24  ;;  %16237 = vmatprep.mubr.msk.f32.mxu1 %vm16816_vm0, %v16815_v1 }
 0x2b1   : > { %16240 = vmatprep.subr.mxu1 %v16815_v1  ;;  %16173 = vmatmul.mubr.f32.vlgmr.msra.gmra.mrb[14].mxu0 %v12941_v27 }
 0x2b2   : > { %16176 = vmatpush3.msra.mxu0 %v16961_v24  ;;  %16177 = vmatprep.mubr.msk.f32.mxu0 %vm16816_vm0, %v16815_v1 }
 0x2b3   : > { %16180 = vmatprep.subr.mxu0 %v16815_v1 }
 0x2b7   : > { %16238 = vmatmul.mubr.f32.vlgmr.msra.gmra.mrb[14].mxu1 %v18032_v17 }
 0x2b8   : > { %16241 = vmatpush3.msra.mxu1 %v16946_v12  ;;  %16242 = vmatprep.mubr.msk.f32.mxu1 %vm16816_vm0, %v16815_v1 }
 0x2b9   : > { %16245 = vmatprep.subr.mxu1 %v16815_v1  ;;  %16178 = vmatmul.mubr.f32.vlgmr.msra.gmra.mrb[14].mxu0 %v18038_v18 }
 0x2ba   : > { %16181 = vmatpush3.msra.mxu0 %v16946_v12  ;;  %16182 = vmatprep.mubr.msk.f32.mxu0 %vm16816_vm0, %v16815_v1  ;;  %v14931_v12 = vld [vmem:[%s16931_s5 + $0xd8] sm:$0xff] }
 0x2bb   : > { %16185 = vmatprep.subr.mxu0 %v16815_v1  ;;  %v14222_v32 = vsel %vm189_vm1, %v14931_v12, 0 }
 0x2bc   : > { %v18118_v35 = vand.u32 4294901760, %v14222_v32 }
 0x2be   : > { %v14291_v38 = vsub.f32 %v14222_v32, %v18118_v35 }
 0x2bf   : > { %16243 = vmatmul.mubr.f32.vlgmr.msra.gmra.mrb[14].mxu1 %v13842_v19 }
 0x2c0   : > { %16246 = vmatpush3.msk.msra.mxu1 %vm16924_vm2, %v16817_v7  ;;  %16247 = vmatprep.mubr.msk.f32.mxu1 %vm16816_vm0, %v16815_v1  ;;  %v14292_v39 = vand.u32 4294901760, %v14291_v38 }
 0x2c1   : > { %16250 = vmatprep.subr.mxu1 %v16815_v1  ;;  %16183 = vmatmul.mubr.f32.vlgmr.msra.gmra.mrb[14].mxu0 %v12938_v20 }
 0x2c2   : > { %16186 = vmatpush3.msk.msra.mxu0 %vm16924_vm2, %v16817_v7  ;;  %16187 = vmatprep.mubr.msk.f32.mxu0 %vm16816_vm0, %v16815_v1  ;;  %v14293_v42 = vsub.f32 %v14291_v38, %v14292_v39 }
 0x2c3   : > { %16190 = vmatprep.subr.mxu0 %v16815_v1 }
 0x2c4   : > { %v14294_v43 = vand.u32 4294901760, %v14293_v42 }
 0x2c6   : > { %v9233_v24 = vpop.f32.mrb[8].mxu1 }
 0x2c7   : > { %16248 = vmatmul.mubr.f32.vlgmr.msra.gmra.mrb[14].mxu1 %v13843_v21  ;;  %9238 = vrot.lane.b32.xlu0 %v9233_v24, %s16818_s15  ;;  %v15929_v28 = vpop.f32.mrb[9].mxu1 }
 0x2c8   : > { %16251 = vmatpush3.msra.mxu1 %v16955_v16  ;;  %16252 = vmatprep.mubr.msk.f32.mxu1 %vm16816_vm0, %v16815_v1  ;;  %v8329_v30 = vpop.f32.mrb[8].mxu0 }
 0x2c9   : > { %16255 = vmatprep.subr.mxu1 %v16815_v1  ;;  %14876 = vst.msk [vmem:[%s17478_s18 + $0x20] sm:$0xff] %vm1088_vm4, %v8329_v30  ;;  %v15869_v33 = vpop.f32.mrb[9].mxu0  ;;  %16188 = vmatmul.mubr.f32.vlgmr.msra.gmra.mrb[14].mxu0 %v12939_v22 }
 0x2ca   : > { %16191 = vmatpush3.msra.mxu0 %v16955_v16  ;;  %16192 = vmatprep.mubr.msk.f32.mxu0 %vm16816_vm0, %v16815_v1  ;;  %v13387_v16 = vsub.f32 %v13318_v34, %v18121_v36 }
 0x2cb   : > { %16195 = vmatprep.subr.mxu0 %v16815_v1 }
 0x2cc   : > { %v13388_v41 = vand.u32 4294901760, %v13387_v16 }
 0x2ce   : > { %v13389_v6 = vsub.f32 %v13387_v16, %v13388_v41 }
 0x2cf   : > { %16253 = vmatmul.mubr.f32.vlgmr.msra.gmra.mrb[14].mxu1 %v18032_v17 }
 0x2d0   : > { %16256 = vmatpush3.msk.msra.mxu1 %vm16924_vm2, %v16817_v7  ;;  %16257 = vmatprep.mubr.msk.f32.mxu1 %vm16816_vm0, %v16815_v1  ;;  %v13390_v45 = vand.u32 4294901760, %v13389_v6 }
 0x2d1   : > { %16260 = vmatprep.subr.mxu1 %v16815_v1  ;;  %16193 = vmatmul.mubr.f32.vlgmr.msra.gmra.mrb[14].mxu0 %v18038_v18 }
 0x2d2   : > { %16196 = vmatpush3.msk.msra.mxu0 %vm16924_vm2, %v16817_v7  ;;  %16197 = vmatprep.mubr.msk.f32.mxu0 %vm16816_vm0, %v16815_v1 }
 0x2d3   : > { %16200 = vmatprep.subr.mxu0 %v16815_v1 }
 0x2d7   : > { %16258 = vmatmul.mubr.f32.vlgmr.msra.gmra.mrb[14].mxu1 %v18032_v17 }
 0x2d8   : > { %16261 = vmatpush3.msk.msra.mxu1 %vm17005_vm3, %v16817_v7  ;;  %16262 = vmatprep.mubr.msk.f32.mxu1 %vm16816_vm0, %v16815_v1 }
 0x2d9   : > { %16265 = vmatprep.subr.mxu1 %v16815_v1  ;;  %16198 = vmatmul.mubr.f32.vlgmr.msra.gmra.mrb[14].mxu0 %v18038_v18 }
 0x2da   : > { %16201 = vmatpush3.msk.msra.mxu0 %vm17005_vm3, %v16817_v7  ;;  %16202 = vmatprep.mubr.msk.f32.mxu0 %vm16816_vm0, %v16815_v1 }
 0x2db   : > { %16205 = vmatprep.subr.mxu0 %v16815_v1 }
 0x2dd   : > { %v7428_v44 = vpop.permute.xlu1 %7427 }
 0x2de   : > { %14867 = vst.msk [vmem:[%s17478_s18 + $0x18] sm:$0xff] %vm1996_vm5, %v7428_v44 }
 0x2df   : > { %16263 = vmatmul.mubr.f32.vlgmr.msra.gmra.mrb[14].mxu1 %v14294_v43 }
 0x2e0   : > { %16266 = vmatpush3.msra.mxu1 %v17056_v46  ;;  %16267 = vmatprep.mubr.msk.f32.mxu1 %vm16816_vm0, %v16815_v1 }
 0x2e1   : > { %16270 = vmatprep.subr.mxu1 %v16815_v1  ;;  %16203 = vmatmul.mubr.f32.vlgmr.msra.gmra.mrb[14].mxu0 %v13390_v45 }
 0x2e2   : > { %16206 = vmatpush3.msra.mxu0 %v17056_v46  ;;  %16207 = vmatprep.mubr.msk.f32.mxu0 %vm16816_vm0, %v16815_v1 }
 0x2e3   : > { %16210 = vmatprep.subr.mxu0 %v16815_v1 }
 0x2e7   : > { %16268 = vmatmul.mubr.f32.vlgmr.msra.gmra.mrb[14].mxu1 %v18118_v35 }
 0x2e8   : > { %16271 = vmatpush3.msra.mxu1 %v17028_v37  ;;  %16272 = vmatprep.mubr.msk.f32.mxu1 %vm16816_vm0, %v16815_v1 }
 0x2e9   : > { %16275 = vmatprep.subr.mxu1 %v16815_v1  ;;  %16208 = vmatmul.mubr.f32.vlgmr.msra.gmra.mrb[14].mxu0 %v18121_v36 }
 0x2ea   : > { %16211 = vmatpush3.msra.mxu0 %v17028_v37  ;;  %16212 = vmatprep.mubr.msk.f32.mxu0 %vm16816_vm0, %v16815_v1 }
 0x2eb   : > { %16215 = vmatprep.subr.mxu0 %v16815_v1 }
 0x2ef   : > { %16273 = vmatmul.mubr.f32.vlgmr.msra.gmra.mrb[14].mxu1 %v14291_v38 }
 0x2f0   : > { %16276 = vmatpush3.msk.msra.mxu1 %vm17005_vm3, %v16817_v7  ;;  %16277 = vmatprep.mubr.msk.f32.mxu1 %vm16816_vm0, %v16815_v1 }
 0x2f1   : > { %16280 = vmatprep.subr.mxu1 %v16815_v1  ;;  %16213 = vmatmul.mubr.f32.vlgmr.msra.gmra.mrb[14].mxu0 %v13387_v16 }
 0x2f2   : > { %16216 = vmatpush3.msk.msra.mxu0 %vm17005_vm3, %v16817_v7  ;;  %16217 = vmatprep.mubr.msk.f32.mxu0 %vm16816_vm0, %v16815_v1 }
 0x2f3   : > { %16220 = vmatprep.subr.mxu0 %v16815_v1 }
 0x2f7   : > { %16278 = vmatmul.mubr.f32.vlgmr.msra.gmra.mrb[14].mxu1 %v14292_v39 }
 0x2f8   : > { %16281 = vmatpush3.msra.mxu1 %v17038_v40  ;;  %16282 = vmatprep.mubr.msk.f32.mxu1 %vm16816_vm0, %v16815_v1 }
 0x2f9   : > { %16285 = vmatprep.subr.mxu1 %v16815_v1  ;;  %16218 = vmatmul.mubr.f32.vlgmr.msra.gmra.mrb[14].mxu0 %v13388_v41 }
 0x2fa   : > { %16221 = vmatpush3.msra.mxu0 %v17038_v40  ;;  %16222 = vmatprep.mubr.msk.f32.mxu0 %vm16816_vm0, %v16815_v1 }
 0x2fb   : > { %16225 = vmatprep.subr.mxu0 %v16815_v1 }
 0x2ff   : > { %16283 = vmatmul.mubr.f32.vlgmr.msra.gmra.mrb[14].mxu1 %v18118_v35 }
 0x300   : > { %16286 = vmatpush3.msk.msra.mxu1 %vm17005_vm3, %v16817_v7  ;;  %16287 = vmatprep.mubr.msk.f32.mxu1 %vm16816_vm0, %v16815_v1 }
 0x301   : > { %16223 = vmatmul.mubr.f32.vlgmr.msra.gmra.mrb[14].mxu0 %v18121_v36 }
 0x302   : > { %16226 = vmatpush3.msk.msra.mxu0 %vm17005_vm3, %v16817_v7  ;;  %16227 = vmatprep.mubr.msk.f32.mxu0 %vm16816_vm0, %v16815_v1 }
 0x307   : > { %16288 = vmatmul.mubr.f32.vlgmr.msra.gmra.mrb[14].mxu1 %v18118_v35 }
 0x309   : > { %16228 = vmatmul.mubr.f32.vlgmr.msra.gmra.mrb[14].mxu0 %v18121_v36 }
 0x322   : > { %v11044_v37 = vpop.f32.mrb[10].mxu1 }
 0x323   : > { %11049 = vrot.lane.b32.xlu1 %v11044_v37, %s16818_s15  ;;  %v16049_v40 = vpop.f32.mrb[11].mxu1 }
 0x324   : > { %v10140_v46 = vpop.f32.mrb[10].mxu0 }
 0x325   : > { %14894 = vst.msk [vmem:[%s17478_s18 + $0x28] sm:$0xff] %vm1088_vm4, %v10140_v46  ;;  %v15989_v47 = vpop.f32.mrb[11].mxu0 }
 0x339   : > { %v9239_v31 = vpop.permute.xlu0 %9238 }
 0x33a   : > { %14885 = vst.msk [vmem:[%s17478_s18 + $0x20] sm:$0xff] %vm1996_vm5, %v9239_v31 }
 0x37e   : > { %v12855_v7 = vpop.f32.mrb[12].mxu1 }
 0x37f   : > { %12860 = vrot.lane.b32.xlu0 %v12855_v7, %s16818_s15  ;;  %v16169_v1 = vpop.f32.mrb[13].mxu1 }
 0x380   : > { %v11951_v48 = vpop.f32.mrb[12].mxu0 }
 0x381   : > { %14912 = vst.msk [vmem:[%s17478_s18 + $0x30] sm:$0xff] %vm1088_vm4, %v11951_v48  ;;  %v16109_v49 = vpop.f32.mrb[13].mxu0 }
 0x395   : > { %v11050_v50 = vpop.permute.xlu1 %11049 }
 0x396   : > { %14903 = vst.msk [vmem:[%s17478_s18 + $0x28] sm:$0xff] %vm1996_vm5, %v11050_v50 }
 0x3da   : > { %v14666_v51 = vpop.f32.mrb[14].mxu1 }
 0x3db   : > { %14671 = vrot.lane.b32.xlu1 %v14666_v51, %s16818_s15  ;;  %v16289_v52 = vpop.f32.mrb[15].mxu1 }
 0x3dc   : > { %v13762_v53 = vpop.f32.mrb[14].mxu0 }
 0x3dd   : > { %14930 = vst.msk [vmem:[%s17478_s18 + $0x38] sm:$0xff] %vm1088_vm4, %v13762_v53  ;;  %v16229_v54 = vpop.f32.mrb[15].mxu0 }
 0x3f1   : > { %v12861_v55 = vpop.permute.xlu0 %12860 }
 0x3f2   : > { %14921 = vst.msk [vmem:[%s17478_s18 + $0x30] sm:$0xff] %vm1996_vm5, %v12861_v55 }
 0x44d   : > { %v14672_v56 = vpop.permute.xlu1 %14671 }
 0x44e   : > { %14939 = vst.msk [vmem:[%s17478_s18 + $0x38] sm:$0xff] %vm1996_vm5, %v14672_v56 }
 0x44f   : > { %16732 = shalt.err (!%p16729_p7)
}
 0x450   : > { %s16733_s4 = scalar_lea.hbm %s18228_s29, 1024  ;;  %s16737_s14 = scalar_lea.hbm %s18289_s1, 4096 }
 0x451   : > { %p16734_p9 = scmp.ne.s32.totalorder %s18228_s29, %s16733_s4  ;;  %p16738_p12 = scmp.lt.u32.totalorder %s18228_s29, %s18289_s1 }
 0x452   : > { %p16739_p13 = scmp.lt.u32.totalorder %s16737_s14, %s16733_s4  ;;  %p16741_p1 = scmp.lt.u32.totalorder %s16733_s4, %s18228_s29 }
 0x453   : > { %p16735_p10 = pnand %p16734_p9, %p16883_p3 }
 0x454   : > { %p16740_p0 = por %p16739_p13, %p16738_p12 }
 0x455   : > { %p16736_p11 = pneg %p16735_p10 }
 0x456   : > { %p16742_p2 = por %p16741_p1, %p16740_p0 }
 0x458   : > { %p16743_p4 = pnand %p16742_p2, %p16736_p11 }
 0x45a   : > { %16746 = shalt.err (!%p16743_p4)
}
 0x45b   : > { %s16820_s21 = smov 128   ;;  %s16821_s22 = smov 8  }
 0x45c   : > { %16642 = dma.vmem_to_hbm [thread:$0]  (%p16883_p3), %s18230_s26, 1024, %s18228_s29, %s18236_s30, %s16820_s21, %s16820_s21, %s16821_s22  }
 0x45d PF: > { %p16648_p5 = scmp.ge.s32.totalorder %s16813_s13, 2  ;;  %s14709_s23 = sand.u32 1, %s16785_s6  }
 0x45e   : > { %s14710_s27 = scalar_lea.sflag [#allocation3], %s14709_s23 }
 0x45f   : > { %p16645_p6 = pnand %p16648_p5, %p16892_p8 }
 0x461   : > { %16780 = dma.done.wait (!%p16645_p6), %s14710_s27, 1024  }
 0x462   : > { %16782 = vsyncadd (!%p16645_p6), %s14710_s27, 4294966272  ;;  %s14_s13 = sadd.s32 1, %s16813_s13   ;;  %s18296_s6 = smov %s16789_s7 }
 0x463   : > { %p11_p7 = scmp.ge.s32.totalorder %s14_s13, 6   ;;  %s18297_s7 = smov %s16793_s8 }
 0x464   : > { %s18298_s8 = smov %s16901_s24  ;;  %s18299_s9 = smov %s16805_s11 }
 0x465   : > { %s18300_s10 = smov %s16809_s12  ;;  %s18301_s11 = smov %s18304_s16 }
 0x466   : > { %s18302_s12 = smov %s18308_s17  ;;  %13 = sbr.rel (!%p11_p7) target bundleno = 5 (0x5), region = 97 }
 0x46d   :  { %14715 = vsyncpa [#allocation3], 1 }
 0x46e   :  { %14717 = vsyncpa [#allocation3 + $0x1], 1 }

</bundles_post_ra>
